<compile_context>
chip_gen: v5e
topology: v5e:2x2
jax: 0.10.0
libtpu: 0.0.40
codegen_flags: <defaults>
</compile_context>

<pallas_src>
import numpy as np

import jax
import jax.numpy as jnp
from jax.experimental import pallas as pl
from jax.experimental.pallas import tpu as pltpu

# ----------------------------- model hyper-params (small) -----------------------------
INPUT_DIM = 18      # matches the module's default input_dim
HIDDEN = 32         # d_model (small version of 256)
NUM_HEADS = 4
HEAD_DIM = HIDDEN // NUM_HEADS
FFN_DIM = 64        # small version of dim_feedforward
NUM_LAYERS = 2
LN_EPS = 1e-5

BATCH = 2
SEQ = 8

LANE = 128          # slab lane width (params zero-padded to 128 columns)
PAD_IN = 32         # input feature dim zero-padded 18 -> 32 (aligned contraction)


# ------------------------------ parameter slab layout ----------------------------------
def _make_layout():
    """Static (row_offset, rows, cols) for every slab entry.

    Matrices keep 8-aligned row offsets; the (1, C) vectors are compacted into
    consecutive single rows (they are only ever read as 1-row broadcast operands).
    """
    mats = [("head_mask", NUM_HEADS * SEQ, HIDDEN),          # block-diag ones (rows=S, cols=D)
            ("seg_mask",  NUM_HEADS * SEQ, NUM_HEADS * SEQ),  # block-diag ones (S x S blocks)
            ("emb_w",     PAD_IN, HIDDEN)]                    # rows 18..31 stay zero
    for l in range(NUM_LAYERS):
        mats += [(f"wq{l}", HIDDEN, HIDDEN), (f"wk{l}", HIDDEN, HIDDEN),
                 (f"wv{l}", HIDDEN, HIDDEN), (f"wo{l}", HIDDEN, HIDDEN),
                 (f"w1_{l}", HIDDEN, FFN_DIM), (f"w2_{l}", FFN_DIM, HIDDEN)]
    mats += [("pw1", HIDDEN, HIDDEN), ("pw2", HIDDEN, INPUT_DIM)]

    vecs = [("emb_b", HIDDEN)]
    for l in range(NUM_LAYERS):
        vecs += [(f"bq{l}", HIDDEN), (f"bk{l}", HIDDEN), (f"bv{l}", HIDDEN),
                 (f"bo{l}", HIDDEN),
                 (f"g1_{l}", HIDDEN), (f"be1_{l}", HIDDEN),
                 (f"b1_{l}", FFN_DIM), (f"b2_{l}", HIDDEN),
                 (f"g2_{l}", HIDDEN), (f"be2_{l}", HIDDEN)]
    vecs += [("pb1", HIDDEN), ("pb2", INPUT_DIM)]

    layout, off = {}, 0
    for name, r, c in mats:
        layout[name] = (off, r, c)
        off += -(-r // 8) * 8
    for name, c in vecs:
        layout[name] = (off, 1, c)
        off += 1
    return layout, -(-off // 8) * 8


LAYOUT, SLAB_ROWS = _make_layout()      # slab is (SLAB_ROWS, 128) f32, ~316 KiB


def _block_mask(block_rows, block_cols, n_blocks):
    m = np.zeros((n_blocks * block_rows, n_blocks * block_cols), np.float32)
    for h in range(n_blocks):
        m[h * block_rows:(h + 1) * block_rows, h * block_cols:(h + 1) * block_cols] = 1.0
    return m


def pack_params(params):
    """Pack parameters (plus the two constant block-diagonal masks) into one f32 slab.

    NOTE for real PyTorch checkpoints: nn.Linear / MHA in_proj weights are stored
    (out_features, in_features) and must be transposed first; in_proj ordering is
    [Q; K; V], matching the wqkv column split below.
    """
    slab = np.zeros((SLAB_ROWS, LANE), np.float32)

    def put(name, arr):
        arr = np.asarray(arr, np.float32)
        off, r, _ = LAYOUT[name]
        assert arr.shape[0] <= r and arr.shape[1] <= LANE
        slab[off:off + arr.shape[0], :arr.shape[1]] = arr

    put("head_mask", _block_mask(SEQ, HEAD_DIM, NUM_HEADS))
    put("seg_mask", _block_mask(SEQ, SEQ, NUM_HEADS))

    put("emb_w", params["emb_w"]); put("emb_b", params["emb_b"])
    for l in range(NUM_LAYERS):
        wqkv = np.asarray(params[f"wqkv{l}"], np.float32)   # (H, 3H), columns Q|K|V
        bqkv = np.asarray(params[f"bqkv{l}"], np.float32)   # (1, 3H)
        put(f"wq{l}", wqkv[:, 0:HIDDEN])
        put(f"wk{l}", wqkv[:, HIDDEN:2 * HIDDEN])
        put(f"wv{l}", wqkv[:, 2 * HIDDEN:3 * HIDDEN])
        put(f"bq{l}", bqkv[:, 0:HIDDEN])
        put(f"bk{l}", bqkv[:, HIDDEN:2 * HIDDEN])
        put(f"bv{l}", bqkv[:, 2 * HIDDEN:3 * HIDDEN])
        put(f"wo{l}", params[f"wo{l}"]); put(f"bo{l}", params[f"bo{l}"])
        put(f"g1_{l}", params[f"g1_{l}"]); put(f"be1_{l}", params[f"be1_{l}"])
        put(f"w1_{l}", params[f"w1_{l}"]); put(f"b1_{l}", params[f"b1_{l}"])
        put(f"w2_{l}", params[f"w2_{l}"]); put(f"b2_{l}", params[f"b2_{l}"])
        put(f"g2_{l}", params[f"g2_{l}"]); put(f"be2_{l}", params[f"be2_{l}"])
    put("pw1", params["pw1"]); put("pb1", params["pb1"])
    put("pw2", params["pw2"]); put("pb2", params["pb2"])
    return jnp.asarray(slab)


# ----------------------------------- kernel body --------------------------------------
def _layer_norm(z, gamma, beta):
    # Fused moments: one pass over z (mean and mean-of-squares together).
    mu = jnp.mean(z, axis=-1, keepdims=True)
    ms = jnp.mean(z * z, axis=-1, keepdims=True)
    var = ms - mu * mu
    return (z - mu) * jax.lax.rsqrt(var + LN_EPS) * gamma + beta


def stepwise_kernel(x_ref, w_ref, out_ref):
    # x_ref  : (B*S, PAD_IN)     zero-padded input rows (all positions, all batches)
    # w_ref  : (SLAB_ROWS, 128)  packed parameter / constant slab
    # out_ref: (B*S, 128)        lane-dense head output (real values in cols [0, 18))

    def get(name, full_lane=False):
        off, r, c = LAYOUT[name]
        return w_ref[off:off + r, :] if full_lane else w_ref[off:off + r, 0:c]

    head_mask = get("head_mask")    # (NH*S, H):     1 where row-head == col-head
    seg_mask = get("seg_mask")      # (NH*S, NH*S):  1 where row-head == col-head

    x = x_ref[...]                                                     # (BS, PAD_IN)
    h = jnp.dot(x, get("emb_w"), preferred_element_type=jnp.float32) + get("emb_b")

    scale = 1.0 / (HEAD_DIM ** 0.5)
    for l in range(NUM_LAYERS):
        # ---- self-attention (post-norm residual), 2-D block-diagonal formulation ----
        q = jnp.dot(h, get(f"wq{l}"), preferred_element_type=jnp.float32) + get(f"bq{l}")
        k = jnp.dot(h, get(f"wk{l}"), preferred_element_type=jnp.float32) + get(f"bk{l}")
        v = jnp.dot(h, get(f"wv{l}"), preferred_element_type=jnp.float32) + get(f"bv{l}")

        ctx_rows = []
        for b in range(BATCH):                      # B=2, unrolled; 8-aligned row slices
            qb = q[b * SEQ:(b + 1) * SEQ, :]        # (S, H)
            kb = k[b * SEQ:(b + 1) * SEQ, :]
            vb = v[b * SEQ:(b + 1) * SEQ, :]

            # Sublane-tile K/V NUM_HEADS times, mask to block-diagonal:
            #   k_bd[h*S + j, h'*D + d] = kb[j, h*D + d]  if h == h' else 0
            k_bd = jnp.concatenate([kb] * NUM_HEADS, axis=0) * head_mask   # (NH*S, H)
            v_bd = jnp.concatenate([vb] * NUM_HEADS, axis=0) * head_mask   # (NH*S, H)

            # scores[q, h*S + j] = <qb[q, head h], kb[j, head h]> / sqrt(D)
            s = jnp.einsum("qd,jd->qj", qb, k_bd,
                           preferred_element_type=jnp.float32) * scale      # (S, NH*S)
            # Per-row global max is constant within every head segment -> segmented
            # softmax stays exact (assumes per-row score range << 80, always true here).
            s = s - jnp.max(s, axis=-1, keepdims=True)
            e = jnp.exp(s)
            denom = jnp.dot(e, seg_mask, preferred_element_type=jnp.float32)  # seg sums
            p = e * pl.reciprocal(denom, approx=True)                         # EUP divide
            # ctx[q, h*D + d] = sum_j p[q, h*S + j] * vb[j, h*D + d]
            # -> heads are already concatenated in their final lane positions.
            ctx_rows.append(jnp.dot(p, v_bd, preferred_element_type=jnp.float32))  # (S,H)
        ctx = jnp.concatenate(ctx_rows, axis=0)                                    # (BS,H)

        attn = jnp.dot(ctx, get(f"wo{l}"),
                       preferred_element_type=jnp.float32) + get(f"bo{l}")
        h = _layer_norm(h + attn, get(f"g1_{l}"), get(f"be1_{l}"))

        # ---- feed-forward block ----
        ff = jnp.maximum(jnp.dot(h, get(f"w1_{l}"),
                                 preferred_element_type=jnp.float32) + get(f"b1_{l}"), 0.0)
        ff = jnp.dot(ff, get(f"w2_{l}"),
                     preferred_element_type=jnp.float32) + get(f"b2_{l}")
        h = _layer_norm(h + ff, get(f"g2_{l}"), get(f"be2_{l}"))

    # ---- predictor head: run on every position (MXU is idle; avoids an in-kernel
    #      last-token row gather) and store one full unmasked lane-dense slab. ----
    y = jnp.maximum(jnp.dot(h, get("pw1"),
                            preferred_element_type=jnp.float32) + get("pb1"), 0.0)
    y = jnp.dot(y, get("pw2", full_lane=True),
                preferred_element_type=jnp.float32) + get("pb2", full_lane=True)
    out_ref[...] = y                                                    # (BS, 128)


# ----------------------------------- wrapper -------------------------------------------
@jax.jit
def stepwise_predictor(x, slab):
    B, S, Din = x.shape
    assert (B, S, Din) == (BATCH, SEQ, INPUT_DIM)
    x2 = x.reshape(B * S, Din)
    x_pad = jnp.pad(x2, ((0, 0), (0, PAD_IN - Din)))   # aligned K for the embed matmul

    out = pl.pallas_call(
        stepwise_kernel,
        out_shape=jax.ShapeDtypeStruct((B * S, LANE), jnp.float32),
        in_specs=[pl.BlockSpec(memory_space=pltpu.MemorySpace.VMEM),
                  pl.BlockSpec(memory_space=pltpu.MemorySpace.VMEM)],
        out_specs=pl.BlockSpec(memory_space=pltpu.MemorySpace.VMEM),
    )(x_pad, slab)
    # head was applied to every position; keep last token, first INPUT_DIM lanes
    return out.reshape(B, S, LANE)[:, -1, :Din]                        # (B, INPUT_DIM)


# ------------------------------- parameter construction --------------------------------
def init_params(key):
    p = {}

    def linear(k, fan_in, fan_out):
        k1, k2 = jax.random.split(k)
        w = jax.random.normal(k1, (fan_in, fan_out), jnp.float32) * 0.05
        b = jax.random.normal(k2, (1, fan_out), jnp.float32) * 0.05
        return w, b

    keys = iter(jax.random.split(key, 1 + 4 * NUM_LAYERS + 2))

    p["emb_w"], p["emb_b"] = linear(next(keys), INPUT_DIM, HIDDEN)
    for l in range(NUM_LAYERS):
        p[f"wqkv{l}"], p[f"bqkv{l}"] = linear(next(keys), HIDDEN, 3 * HIDDEN)  # in_proj
        p[f"wo{l}"], p[f"bo{l}"] = linear(next(keys), HIDDEN, HIDDEN)          # out_proj
        p[f"g1_{l}"] = jnp.ones((1, HIDDEN), jnp.float32)
        p[f"be1_{l}"] = jnp.zeros((1, HIDDEN), jnp.float32)
        p[f"w1_{l}"], p[f"b1_{l}"] = linear(next(keys), HIDDEN, FFN_DIM)       # linear1
        p[f"w2_{l}"], p[f"b2_{l}"] = linear(next(keys), FFN_DIM, HIDDEN)       # linear2
        p[f"g2_{l}"] = jnp.ones((1, HIDDEN), jnp.float32)
        p[f"be2_{l}"] = jnp.zeros((1, HIDDEN), jnp.float32)
    p["pw1"], p["pb1"] = linear(next(keys), HIDDEN, HIDDEN)
    p["pw2"], p["pb2"] = linear(next(keys), HIDDEN, INPUT_DIM)
    return p


# ----------------------------------- reference -----------------------------------------
def reference(x, p):
    """Independently written pure-JAX forward mirroring PyTorch TransformerEncoderLayer
    (post-norm, ReLU FF, packed QKV, dropout=identity) — not shared with the kernel."""

    def ln(z, g, b):
        mu = jnp.mean(z, axis=-1, keepdims=True)
        var = jnp.var(z, axis=-1, keepdims=True)
        return (z - mu) / jnp.sqrt(var + LN_EPS) * g + b

    h = x @ p["emb_w"] + p["emb_b"]                                   # (B, S, H)
    B_, S_, _ = h.shape
    for l in range(NUM_LAYERS):
        qkv = h @ p[f"wqkv{l}"] + p[f"bqkv{l}"]
        q, k, v = jnp.split(qkv, 3, axis=-1)

        def heads(t):
            return t.reshape(B_, S_, NUM_HEADS, HEAD_DIM).transpose(0, 2, 1, 3)

        qh, kh, vh = heads(q), heads(k), heads(v)
        sc = jnp.einsum("bhqd,bhkd->bhqk", qh, kh) / jnp.sqrt(float(HEAD_DIM))
        a = jax.nn.softmax(sc, axis=-1)
        ctx = jnp.einsum("bhqk,bhkd->bhqd", a, vh)
        ctx = ctx.transpose(0, 2, 1, 3).reshape(B_, S_, HIDDEN)
        attn = ctx @ p[f"wo{l}"] + p[f"bo{l}"]
        h = ln(h + attn, p[f"g1_{l}"], p[f"be1_{l}"])

        ff = jax.nn.relu(h @ p[f"w1_{l}"] + p[f"b1_{l}"])
        ff = ff @ p[f"w2_{l}"] + p[f"b2_{l}"]
        h = ln(h + ff, p[f"g2_{l}"], p[f"be2_{l}"])

    last = h[:, -1, :]                                                # (B, H)
    y = jax.nn.relu(last @ p["pw1"] + p["pb1"])
    return y @ p["pw2"] + p["pb2"]                                    # (B, INPUT_DIM)


# ------------------------------------- main ---------------------------------------------
if __name__ == "__main__":
    key = jax.random.PRNGKey(0)
    kx, kp = jax.random.split(key)

    x = jax.random.normal(kx, (BATCH, SEQ, INPUT_DIM), jnp.float32)
    params = init_params(kp)
    slab = pack_params(params)

    y = jax.block_until_ready(stepwise_predictor(x, slab))
    y_ref = reference(x, params)

    assert y.shape == (BATCH, INPUT_DIM)
    max_diff = float(jnp.max(jnp.abs(y - y_ref)))
    # 1e-3 headroom: the only intentional numeric deviations are the EUP approx
    # reciprocal in the softmax denominator and fused-moment LayerNorm; real bugs
    # would show up as O(1e-1) differences.
    assert max_diff < 1e-3, f"max abs diff {max_diff}"

    # TODO(synk): validate against an exported PyTorch StepwisePredictor checkpoint
    # (torch unavailable in this sandbox); nn.Linear / in_proj weights need a transpose
    # and the in_proj Q/K/V ordering must match pack_params' column split.
    print("KERNEL_OK")
</pallas_src>

<mosaic_0001>
module attributes {stable_mosaic.version = 11 : i64} {
  func.func @stepwise_kernel(%arg0: memref<16x32xf32, #tpu.memory_space<vmem>>, %arg1: memref<632x128xf32, #tpu.memory_space<vmem>>, %arg2: memref<16x128xf32, #tpu.memory_space<vmem>>) attributes {dimension_semantics = [], scalar_prefetch = 0 : i64, scratch_operands = 0 : i64, tpu.core_type = #tpu.core_type<tc>} {
    %c0 = arith.constant 0 : index
    %c0_0 = arith.constant 0 : index
    %0 = vector.load %arg1[%c0, %c0_0] : memref<632x128xf32, #tpu.memory_space<vmem>>, vector<32x32xf32>
    %c32 = arith.constant 32 : index
    %c0_1 = arith.constant 0 : index
    %1 = vector.load %arg1[%c32, %c0_1] : memref<632x128xf32, #tpu.memory_space<vmem>>, vector<32x32xf32>
    %c0_2 = arith.constant 0 : index
    %c0_3 = arith.constant 0 : index
    %2 = vector.load %arg0[%c0_2, %c0_3] : memref<16x32xf32, #tpu.memory_space<vmem>>, vector<16x32xf32>
    %c64 = arith.constant 64 : index
    %c0_4 = arith.constant 0 : index
    %3 = vector.load %arg1[%c64, %c0_4] : memref<632x128xf32, #tpu.memory_space<vmem>>, vector<32x32xf32>
    %cst = arith.constant dense<0.000000e+00> : vector<16x32xf32>
    %4 = tpu.matmul %2, %3, %cst {dimension_numbers = #tpu.dot_dimension_numbers<[1], [0], [0], [1], [0, 0, 1, 1], [], []>} : vector<16x32xf32>, vector<32x32xf32>, vector<16x32xf32> -> vector<16x32xf32>
    %c608 = arith.constant 608 : index
    %c0_5 = arith.constant 0 : index
    %5 = vector.load %arg1[%c608, %c0_5] : memref<632x128xf32, #tpu.memory_space<vmem>>, vector<1x32xf32>
    %6 = vector.broadcast %5 : vector<1x32xf32> to vector<16x32xf32>
    %7 = arith.addf %4, %6 : vector<16x32xf32>
    %c96 = arith.constant 96 : index
    %c0_6 = arith.constant 0 : index
    %8 = vector.load %arg1[%c96, %c0_6] : memref<632x128xf32, #tpu.memory_space<vmem>>, vector<32x32xf32>
    %cst_7 = arith.constant dense<0.000000e+00> : vector<16x32xf32>
    %9 = tpu.matmul %7, %8, %cst_7 {dimension_numbers = #tpu.dot_dimension_numbers<[1], [0], [0], [1], [0, 0, 1, 1], [], []>} : vector<16x32xf32>, vector<32x32xf32>, vector<16x32xf32> -> vector<16x32xf32>
    %c609 = arith.constant 609 : index
    %c0_8 = arith.constant 0 : index
    %10 = vector.load %arg1[%c609, %c0_8] : memref<632x128xf32, #tpu.memory_space<vmem>>, vector<1x32xf32>
    %11 = vector.broadcast %10 : vector<1x32xf32> to vector<16x32xf32>
    %12 = arith.addf %9, %11 : vector<16x32xf32>
    %c128 = arith.constant 128 : index
    %c0_9 = arith.constant 0 : index
    %13 = vector.load %arg1[%c128, %c0_9] : memref<632x128xf32, #tpu.memory_space<vmem>>, vector<32x32xf32>
    %cst_10 = arith.constant dense<0.000000e+00> : vector<16x32xf32>
    %14 = tpu.matmul %7, %13, %cst_10 {dimension_numbers = #tpu.dot_dimension_numbers<[1], [0], [0], [1], [0, 0, 1, 1], [], []>} : vector<16x32xf32>, vector<32x32xf32>, vector<16x32xf32> -> vector<16x32xf32>
    %c610 = arith.constant 610 : index
    %c0_11 = arith.constant 0 : index
    %15 = vector.load %arg1[%c610, %c0_11] : memref<632x128xf32, #tpu.memory_space<vmem>>, vector<1x32xf32>
    %16 = vector.broadcast %15 : vector<1x32xf32> to vector<16x32xf32>
    %17 = arith.addf %14, %16 : vector<16x32xf32>
    %c160 = arith.constant 160 : index
    %c0_12 = arith.constant 0 : index
    %18 = vector.load %arg1[%c160, %c0_12] : memref<632x128xf32, #tpu.memory_space<vmem>>, vector<32x32xf32>
    %cst_13 = arith.constant dense<0.000000e+00> : vector<16x32xf32>
    %19 = tpu.matmul %7, %18, %cst_13 {dimension_numbers = #tpu.dot_dimension_numbers<[1], [0], [0], [1], [0, 0, 1, 1], [], []>} : vector<16x32xf32>, vector<32x32xf32>, vector<16x32xf32> -> vector<16x32xf32>
    %c611 = arith.constant 611 : index
    %c0_14 = arith.constant 0 : index
    %20 = vector.load %arg1[%c611, %c0_14] : memref<632x128xf32, #tpu.memory_space<vmem>>, vector<1x32xf32>
    %21 = vector.broadcast %20 : vector<1x32xf32> to vector<16x32xf32>
    %22 = arith.addf %19, %21 : vector<16x32xf32>
    %23 = vector.extract_strided_slice %12 {offsets = [0, 0], sizes = [8, 32], strides = [1, 1]} : vector<16x32xf32> to vector<8x32xf32>
    %24 = vector.extract_strided_slice %17 {offsets = [0, 0], sizes = [8, 32], strides = [1, 1]} : vector<16x32xf32> to vector<8x32xf32>
    %25 = vector.extract_strided_slice %22 {offsets = [0, 0], sizes = [8, 32], strides = [1, 1]} : vector<16x32xf32> to vector<8x32xf32>
    %26 = tpu.concatenate %24, %24, %24, %24 in 0 : vector<8x32xf32>, vector<8x32xf32>, vector<8x32xf32>, vector<8x32xf32> -> vector<32x32xf32>
    %27 = arith.mulf %26, %0 : vector<32x32xf32>
    %28 = tpu.concatenate %25, %25, %25, %25 in 0 : vector<8x32xf32>, vector<8x32xf32>, vector<8x32xf32>, vector<8x32xf32> -> vector<32x32xf32>
    %29 = arith.mulf %28, %0 : vector<32x32xf32>
    "tpu.trace_start"() <{level = 10 : i32, message = "qd,jd->qj"}> : () -> ()
    %cst_15 = arith.constant dense<0.000000e+00> : vector<8x32xf32>
    %30 = tpu.matmul %23, %27, %cst_15 {dimension_numbers = #tpu.dot_dimension_numbers<[1], [1], [0], [0], [0, 0, 1, 0], [], []>} : vector<8x32xf32>, vector<32x32xf32>, vector<8x32xf32> -> vector<8x32xf32>
    "tpu.trace_stop"() : () -> ()
    %cst_16 = arith.constant 0.353553385 : f32
    %31 = vector.broadcast %cst_16 : f32 to vector<8x32xf32>
    %32 = arith.mulf %30, %31 : vector<8x32xf32>
    %cst_17 = arith.constant dense<0xFF800000> : vector<8xf32>
    %33 = vector.multi_reduction <maximumf>, %32, %cst_17 [1] : vector<8x32xf32> to vector<8xf32>
    %34 = vector.shape_cast %33 : vector<8xf32> to vector<8x1xf32>
    %35 = vector.broadcast %34 : vector<8x1xf32> to vector<8x32xf32>
    %36 = arith.subf %32, %35 : vector<8x32xf32>
    %37 = math.exp %36 : vector<8x32xf32>
    %cst_18 = arith.constant dense<0.000000e+00> : vector<8x32xf32>
    %38 = tpu.matmul %37, %1, %cst_18 {dimension_numbers = #tpu.dot_dimension_numbers<[1], [0], [0], [1], [0, 0, 1, 1], [], []>} : vector<8x32xf32>, vector<32x32xf32>, vector<8x32xf32> -> vector<8x32xf32>
    %39 = tpu.reciprocal %38 {approx = true} : vector<8x32xf32> -> vector<8x32xf32>
    %40 = arith.mulf %37, %39 : vector<8x32xf32>
    %cst_19 = arith.constant dense<0.000000e+00> : vector<8x32xf32>
    %41 = tpu.matmul %40, %29, %cst_19 {dimension_numbers = #tpu.dot_dimension_numbers<[1], [0], [0], [1], [0, 0, 1, 1], [], []>} : vector<8x32xf32>, vector<32x32xf32>, vector<8x32xf32> -> vector<8x32xf32>
    %42 = vector.extract_strided_slice %12 {offsets = [8, 0], sizes = [8, 32], strides = [1, 1]} : vector<16x32xf32> to vector<8x32xf32>
    %43 = vector.extract_strided_slice %17 {offsets = [8, 0], sizes = [8, 32], strides = [1, 1]} : vector<16x32xf32> to vector<8x32xf32>
    %44 = vector.extract_strided_slice %22 {offsets = [8, 0], sizes = [8, 32], strides = [1, 1]} : vector<16x32xf32> to vector<8x32xf32>
    %45 = tpu.concatenate %43, %43, %43, %43 in 0 : vector<8x32xf32>, vector<8x32xf32>, vector<8x32xf32>, vector<8x32xf32> -> vector<32x32xf32>
    %46 = arith.mulf %45, %0 : vector<32x32xf32>
    %47 = tpu.concatenate %44, %44, %44, %44 in 0 : vector<8x32xf32>, vector<8x32xf32>, vector<8x32xf32>, vector<8x32xf32> -> vector<32x32xf32>
    %48 = arith.mulf %47, %0 : vector<32x32xf32>
    "tpu.trace_start"() <{level = 10 : i32, message = "qd,jd->qj"}> : () -> ()
    %cst_20 = arith.constant dense<0.000000e+00> : vector<8x32xf32>
    %49 = tpu.matmul %42, %46, %cst_20 {dimension_numbers = #tpu.dot_dimension_numbers<[1], [1], [0], [0], [0, 0, 1, 0], [], []>} : vector<8x32xf32>, vector<32x32xf32>, vector<8x32xf32> -> vector<8x32xf32>
    "tpu.trace_stop"() : () -> ()
    %cst_21 = arith.constant 0.353553385 : f32
    %50 = vector.broadcast %cst_21 : f32 to vector<8x32xf32>
    %51 = arith.mulf %49, %50 : vector<8x32xf32>
    %cst_22 = arith.constant dense<0xFF800000> : vector<8xf32>
    %52 = vector.multi_reduction <maximumf>, %51, %cst_22 [1] : vector<8x32xf32> to vector<8xf32>
    %53 = vector.shape_cast %52 : vector<8xf32> to vector<8x1xf32>
    %54 = vector.broadcast %53 : vector<8x1xf32> to vector<8x32xf32>
    %55 = arith.subf %51, %54 : vector<8x32xf32>
    %56 = math.exp %55 : vector<8x32xf32>
    %cst_23 = arith.constant dense<0.000000e+00> : vector<8x32xf32>
    %57 = tpu.matmul %56, %1, %cst_23 {dimension_numbers = #tpu.dot_dimension_numbers<[1], [0], [0], [1], [0, 0, 1, 1], [], []>} : vector<8x32xf32>, vector<32x32xf32>, vector<8x32xf32> -> vector<8x32xf32>
    %58 = tpu.reciprocal %57 {approx = true} : vector<8x32xf32> -> vector<8x32xf32>
    %59 = arith.mulf %56, %58 : vector<8x32xf32>
    %cst_24 = arith.constant dense<0.000000e+00> : vector<8x32xf32>
    %60 = tpu.matmul %59, %48, %cst_24 {dimension_numbers = #tpu.dot_dimension_numbers<[1], [0], [0], [1], [0, 0, 1, 1], [], []>} : vector<8x32xf32>, vector<32x32xf32>, vector<8x32xf32> -> vector<8x32xf32>
    %61 = tpu.concatenate %41, %60 in 0 : vector<8x32xf32>, vector<8x32xf32> -> vector<16x32xf32>
    %c192 = arith.constant 192 : index
    %c0_25 = arith.constant 0 : index
    %62 = vector.load %arg1[%c192, %c0_25] : memref<632x128xf32, #tpu.memory_space<vmem>>, vector<32x32xf32>
    %cst_26 = arith.constant dense<0.000000e+00> : vector<16x32xf32>
    %63 = tpu.matmul %61, %62, %cst_26 {dimension_numbers = #tpu.dot_dimension_numbers<[1], [0], [0], [1], [0, 0, 1, 1], [], []>} : vector<16x32xf32>, vector<32x32xf32>, vector<16x32xf32> -> vector<16x32xf32>
    %c612 = arith.constant 612 : index
    %c0_27 = arith.constant 0 : index
    %64 = vector.load %arg1[%c612, %c0_27] : memref<632x128xf32, #tpu.memory_space<vmem>>, vector<1x32xf32>
    %65 = vector.broadcast %64 : vector<1x32xf32> to vector<16x32xf32>
    %66 = arith.addf %63, %65 : vector<16x32xf32>
    %67 = arith.addf %7, %66 : vector<16x32xf32>
    %c613 = arith.constant 613 : index
    %c0_28 = arith.constant 0 : index
    %68 = vector.load %arg1[%c613, %c0_28] : memref<632x128xf32, #tpu.memory_space<vmem>>, vector<1x32xf32>
    %c614 = arith.constant 614 : index
    %c0_29 = arith.constant 0 : index
    %69 = vector.load %arg1[%c614, %c0_29] : memref<632x128xf32, #tpu.memory_space<vmem>>, vector<1x32xf32>
    %cst_30 = arith.constant dense<0.000000e+00> : vector<16xf32>
    %70 = vector.multi_reduction <add>, %67, %cst_30 [1] : vector<16x32xf32> to vector<16xf32>
    %71 = vector.shape_cast %70 : vector<16xf32> to vector<16x1xf32>
    %cst_31 = arith.constant 3.200000e+01 : f32
    %72 = vector.broadcast %cst_31 : f32 to vector<16x1xf32>
    %73 = arith.divf %71, %72 : vector<16x1xf32>
    %74 = arith.mulf %67, %67 : vector<16x32xf32>
    %cst_32 = arith.constant dense<0.000000e+00> : vector<16xf32>
    %75 = vector.multi_reduction <add>, %74, %cst_32 [1] : vector<16x32xf32> to vector<16xf32>
    %76 = vector.shape_cast %75 : vector<16xf32> to vector<16x1xf32>
    %cst_33 = arith.constant 3.200000e+01 : f32
    %77 = vector.broadcast %cst_33 : f32 to vector<16x1xf32>
    %78 = arith.divf %76, %77 : vector<16x1xf32>
    %79 = arith.mulf %73, %73 : vector<16x1xf32>
    %80 = arith.subf %78, %79 : vector<16x1xf32>
    %81 = vector.broadcast %73 : vector<16x1xf32> to vector<16x32xf32>
    %82 = arith.subf %67, %81 : vector<16x32xf32>
    %cst_34 = arith.constant 9.99999974E-6 : f32
    %83 = vector.broadcast %cst_34 : f32 to vector<16x1xf32>
    %84 = arith.addf %80, %83 : vector<16x1xf32>
    %85 = math.rsqrt %84 : vector<16x1xf32>
    %86 = vector.broadcast %85 : vector<16x1xf32> to vector<16x32xf32>
    %87 = arith.mulf %82, %86 : vector<16x32xf32>
    %88 = vector.broadcast %68 : vector<1x32xf32> to vector<16x32xf32>
    %89 = arith.mulf %87, %88 : vector<16x32xf32>
    %90 = vector.broadcast %69 : vector<1x32xf32> to vector<16x32xf32>
    %91 = arith.addf %89, %90 : vector<16x32xf32>
    %c224 = arith.constant 224 : index
    %c0_35 = arith.constant 0 : index
    %92 = vector.load %arg1[%c224, %c0_35] : memref<632x128xf32, #tpu.memory_space<vmem>>, vector<32x64xf32>
    %cst_36 = arith.constant dense<0.000000e+00> : vector<16x64xf32>
    %93 = tpu.matmul %91, %92, %cst_36 {dimension_numbers = #tpu.dot_dimension_numbers<[1], [0], [0], [1], [0, 0, 1, 1], [], []>} : vector<16x32xf32>, vector<32x64xf32>, vector<16x64xf32> -> vector<16x64xf32>
    %c615 = arith.constant 615 : index
    %c0_37 = arith.constant 0 : index
    %94 = vector.load %arg1[%c615, %c0_37] : memref<632x128xf32, #tpu.memory_space<vmem>>, vector<1x64xf32>
    %95 = vector.broadcast %94 : vector<1x64xf32> to vector<16x64xf32>
    %96 = arith.addf %93, %95 : vector<16x64xf32>
    %cst_38 = arith.constant 0.000000e+00 : f32
    %97 = vector.broadcast %cst_38 : f32 to vector<16x64xf32>
    %98 = arith.maximumf %96, %97 : vector<16x64xf32>
    %c256 = arith.constant 256 : index
    %c0_39 = arith.constant 0 : index
    %99 = vector.load %arg1[%c256, %c0_39] : memref<632x128xf32, #tpu.memory_space<vmem>>, vector<64x32xf32>
    %cst_40 = arith.constant dense<0.000000e+00> : vector<16x32xf32>
    %100 = tpu.matmul %98, %99, %cst_40 {dimension_numbers = #tpu.dot_dimension_numbers<[1], [0], [0], [1], [0, 0, 1, 1], [], []>} : vector<16x64xf32>, vector<64x32xf32>, vector<16x32xf32> -> vector<16x32xf32>
    %c616 = arith.constant 616 : index
    %c0_41 = arith.constant 0 : index
    %101 = vector.load %arg1[%c616, %c0_41] : memref<632x128xf32, #tpu.memory_space<vmem>>, vector<1x32xf32>
    %102 = vector.broadcast %101 : vector<1x32xf32> to vector<16x32xf32>
    %103 = arith.addf %100, %102 : vector<16x32xf32>
    %104 = arith.addf %91, %103 : vector<16x32xf32>
    %c617 = arith.constant 617 : index
    %c0_42 = arith.constant 0 : index
    %105 = vector.load %arg1[%c617, %c0_42] : memref<632x128xf32, #tpu.memory_space<vmem>>, vector<1x32xf32>
    %c618 = arith.constant 618 : index
    %c0_43 = arith.constant 0 : index
    %106 = vector.load %arg1[%c618, %c0_43] : memref<632x128xf32, #tpu.memory_space<vmem>>, vector<1x32xf32>
    %cst_44 = arith.constant dense<0.000000e+00> : vector<16xf32>
    %107 = vector.multi_reduction <add>, %104, %cst_44 [1] : vector<16x32xf32> to vector<16xf32>
    %108 = vector.shape_cast %107 : vector<16xf32> to vector<16x1xf32>
    %cst_45 = arith.constant 3.200000e+01 : f32
    %109 = vector.broadcast %cst_45 : f32 to vector<16x1xf32>
    %110 = arith.divf %108, %109 : vector<16x1xf32>
    %111 = arith.mulf %104, %104 : vector<16x32xf32>
    %cst_46 = arith.constant dense<0.000000e+00> : vector<16xf32>
    %112 = vector.multi_reduction <add>, %111, %cst_46 [1] : vector<16x32xf32> to vector<16xf32>
    %113 = vector.shape_cast %112 : vector<16xf32> to vector<16x1xf32>
    %cst_47 = arith.constant 3.200000e+01 : f32
    %114 = vector.broadcast %cst_47 : f32 to vector<16x1xf32>
    %115 = arith.divf %113, %114 : vector<16x1xf32>
    %116 = arith.mulf %110, %110 : vector<16x1xf32>
    %117 = arith.subf %115, %116 : vector<16x1xf32>
    %118 = vector.broadcast %110 : vector<16x1xf32> to vector<16x32xf32>
    %119 = arith.subf %104, %118 : vector<16x32xf32>
    %cst_48 = arith.constant 9.99999974E-6 : f32
    %120 = vector.broadcast %cst_48 : f32 to vector<16x1xf32>
    %121 = arith.addf %117, %120 : vector<16x1xf32>
    %122 = math.rsqrt %121 : vector<16x1xf32>
    %123 = vector.broadcast %122 : vector<16x1xf32> to vector<16x32xf32>
    %124 = arith.mulf %119, %123 : vector<16x32xf32>
    %125 = vector.broadcast %105 : vector<1x32xf32> to vector<16x32xf32>
    %126 = arith.mulf %124, %125 : vector<16x32xf32>
    %127 = vector.broadcast %106 : vector<1x32xf32> to vector<16x32xf32>
    %128 = arith.addf %126, %127 : vector<16x32xf32>
    %c320 = arith.constant 320 : index
    %c0_49 = arith.constant 0 : index
    %129 = vector.load %arg1[%c320, %c0_49] : memref<632x128xf32, #tpu.memory_space<vmem>>, vector<32x32xf32>
    %cst_50 = arith.constant dense<0.000000e+00> : vector<16x32xf32>
    %130 = tpu.matmul %128, %129, %cst_50 {dimension_numbers = #tpu.dot_dimension_numbers<[1], [0], [0], [1], [0, 0, 1, 1], [], []>} : vector<16x32xf32>, vector<32x32xf32>, vector<16x32xf32> -> vector<16x32xf32>
    %c619 = arith.constant 619 : index
    %c0_51 = arith.constant 0 : index
    %131 = vector.load %arg1[%c619, %c0_51] : memref<632x128xf32, #tpu.memory_space<vmem>>, vector<1x32xf32>
    %132 = vector.broadcast %131 : vector<1x32xf32> to vector<16x32xf32>
    %133 = arith.addf %130, %132 : vector<16x32xf32>
    %c352 = arith.constant 352 : index
    %c0_52 = arith.constant 0 : index
    %134 = vector.load %arg1[%c352, %c0_52] : memref<632x128xf32, #tpu.memory_space<vmem>>, vector<32x32xf32>
    %cst_53 = arith.constant dense<0.000000e+00> : vector<16x32xf32>
    %135 = tpu.matmul %128, %134, %cst_53 {dimension_numbers = #tpu.dot_dimension_numbers<[1], [0], [0], [1], [0, 0, 1, 1], [], []>} : vector<16x32xf32>, vector<32x32xf32>, vector<16x32xf32> -> vector<16x32xf32>
    %c620 = arith.constant 620 : index
    %c0_54 = arith.constant 0 : index
    %136 = vector.load %arg1[%c620, %c0_54] : memref<632x128xf32, #tpu.memory_space<vmem>>, vector<1x32xf32>
    %137 = vector.broadcast %136 : vector<1x32xf32> to vector<16x32xf32>
    %138 = arith.addf %135, %137 : vector<16x32xf32>
    %c384 = arith.constant 384 : index
    %c0_55 = arith.constant 0 : index
    %139 = vector.load %arg1[%c384, %c0_55] : memref<632x128xf32, #tpu.memory_space<vmem>>, vector<32x32xf32>
    %cst_56 = arith.constant dense<0.000000e+00> : vector<16x32xf32>
    %140 = tpu.matmul %128, %139, %cst_56 {dimension_numbers = #tpu.dot_dimension_numbers<[1], [0], [0], [1], [0, 0, 1, 1], [], []>} : vector<16x32xf32>, vector<32x32xf32>, vector<16x32xf32> -> vector<16x32xf32>
    %c621 = arith.constant 621 : index
    %c0_57 = arith.constant 0 : index
    %141 = vector.load %arg1[%c621, %c0_57] : memref<632x128xf32, #tpu.memory_space<vmem>>, vector<1x32xf32>
    %142 = vector.broadcast %141 : vector<1x32xf32> to vector<16x32xf32>
    %143 = arith.addf %140, %142 : vector<16x32xf32>
    %144 = vector.extract_strided_slice %133 {offsets = [0, 0], sizes = [8, 32], strides = [1, 1]} : vector<16x32xf32> to vector<8x32xf32>
    %145 = vector.extract_strided_slice %138 {offsets = [0, 0], sizes = [8, 32], strides = [1, 1]} : vector<16x32xf32> to vector<8x32xf32>
    %146 = vector.extract_strided_slice %143 {offsets = [0, 0], sizes = [8, 32], strides = [1, 1]} : vector<16x32xf32> to vector<8x32xf32>
    %147 = tpu.concatenate %145, %145, %145, %145 in 0 : vector<8x32xf32>, vector<8x32xf32>, vector<8x32xf32>, vector<8x32xf32> -> vector<32x32xf32>
    %148 = arith.mulf %147, %0 : vector<32x32xf32>
    %149 = tpu.concatenate %146, %146, %146, %146 in 0 : vector<8x32xf32>, vector<8x32xf32>, vector<8x32xf32>, vector<8x32xf32> -> vector<32x32xf32>
    %150 = arith.mulf %149, %0 : vector<32x32xf32>
    "tpu.trace_start"() <{level = 10 : i32, message = "qd,jd->qj"}> : () -> ()
    %cst_58 = arith.constant dense<0.000000e+00> : vector<8x32xf32>
    %151 = tpu.matmul %144, %148, %cst_58 {dimension_numbers = #tpu.dot_dimension_numbers<[1], [1], [0], [0], [0, 0, 1, 0], [], []>} : vector<8x32xf32>, vector<32x32xf32>, vector<8x32xf32> -> vector<8x32xf32>
    "tpu.trace_stop"() : () -> ()
    %cst_59 = arith.constant 0.353553385 : f32
    %152 = vector.broadcast %cst_59 : f32 to vector<8x32xf32>
    %153 = arith.mulf %151, %152 : vector<8x32xf32>
    %cst_60 = arith.constant dense<0xFF800000> : vector<8xf32>
    %154 = vector.multi_reduction <maximumf>, %153, %cst_60 [1] : vector<8x32xf32> to vector<8xf32>
    %155 = vector.shape_cast %154 : vector<8xf32> to vector<8x1xf32>
    %156 = vector.broadcast %155 : vector<8x1xf32> to vector<8x32xf32>
    %157 = arith.subf %153, %156 : vector<8x32xf32>
    %158 = math.exp %157 : vector<8x32xf32>
    %cst_61 = arith.constant dense<0.000000e+00> : vector<8x32xf32>
    %159 = tpu.matmul %158, %1, %cst_61 {dimension_numbers = #tpu.dot_dimension_numbers<[1], [0], [0], [1], [0, 0, 1, 1], [], []>} : vector<8x32xf32>, vector<32x32xf32>, vector<8x32xf32> -> vector<8x32xf32>
    %160 = tpu.reciprocal %159 {approx = true} : vector<8x32xf32> -> vector<8x32xf32>
    %161 = arith.mulf %158, %160 : vector<8x32xf32>
    %cst_62 = arith.constant dense<0.000000e+00> : vector<8x32xf32>
    %162 = tpu.matmul %161, %150, %cst_62 {dimension_numbers = #tpu.dot_dimension_numbers<[1], [0], [0], [1], [0, 0, 1, 1], [], []>} : vector<8x32xf32>, vector<32x32xf32>, vector<8x32xf32> -> vector<8x32xf32>
    %163 = vector.extract_strided_slice %133 {offsets = [8, 0], sizes = [8, 32], strides = [1, 1]} : vector<16x32xf32> to vector<8x32xf32>
    %164 = vector.extract_strided_slice %138 {offsets = [8, 0], sizes = [8, 32], strides = [1, 1]} : vector<16x32xf32> to vector<8x32xf32>
    %165 = vector.extract_strided_slice %143 {offsets = [8, 0], sizes = [8, 32], strides = [1, 1]} : vector<16x32xf32> to vector<8x32xf32>
    %166 = tpu.concatenate %164, %164, %164, %164 in 0 : vector<8x32xf32>, vector<8x32xf32>, vector<8x32xf32>, vector<8x32xf32> -> vector<32x32xf32>
    %167 = arith.mulf %166, %0 : vector<32x32xf32>
    %168 = tpu.concatenate %165, %165, %165, %165 in 0 : vector<8x32xf32>, vector<8x32xf32>, vector<8x32xf32>, vector<8x32xf32> -> vector<32x32xf32>
    %169 = arith.mulf %168, %0 : vector<32x32xf32>
    "tpu.trace_start"() <{level = 10 : i32, message = "qd,jd->qj"}> : () -> ()
    %cst_63 = arith.constant dense<0.000000e+00> : vector<8x32xf32>
    %170 = tpu.matmul %163, %167, %cst_63 {dimension_numbers = #tpu.dot_dimension_numbers<[1], [1], [0], [0], [0, 0, 1, 0], [], []>} : vector<8x32xf32>, vector<32x32xf32>, vector<8x32xf32> -> vector<8x32xf32>
    "tpu.trace_stop"() : () -> ()
    %cst_64 = arith.constant 0.353553385 : f32
    %171 = vector.broadcast %cst_64 : f32 to vector<8x32xf32>
    %172 = arith.mulf %170, %171 : vector<8x32xf32>
    %cst_65 = arith.constant dense<0xFF800000> : vector<8xf32>
    %173 = vector.multi_reduction <maximumf>, %172, %cst_65 [1] : vector<8x32xf32> to vector<8xf32>
    %174 = vector.shape_cast %173 : vector<8xf32> to vector<8x1xf32>
    %175 = vector.broadcast %174 : vector<8x1xf32> to vector<8x32xf32>
    %176 = arith.subf %172, %175 : vector<8x32xf32>
    %177 = math.exp %176 : vector<8x32xf32>
    %cst_66 = arith.constant dense<0.000000e+00> : vector<8x32xf32>
    %178 = tpu.matmul %177, %1, %cst_66 {dimension_numbers = #tpu.dot_dimension_numbers<[1], [0], [0], [1], [0, 0, 1, 1], [], []>} : vector<8x32xf32>, vector<32x32xf32>, vector<8x32xf32> -> vector<8x32xf32>
    %179 = tpu.reciprocal %178 {approx = true} : vector<8x32xf32> -> vector<8x32xf32>
    %180 = arith.mulf %177, %179 : vector<8x32xf32>
    %cst_67 = arith.constant dense<0.000000e+00> : vector<8x32xf32>
    %181 = tpu.matmul %180, %169, %cst_67 {dimension_numbers = #tpu.dot_dimension_numbers<[1], [0], [0], [1], [0, 0, 1, 1], [], []>} : vector<8x32xf32>, vector<32x32xf32>, vector<8x32xf32> -> vector<8x32xf32>
    %182 = tpu.concatenate %162, %181 in 0 : vector<8x32xf32>, vector<8x32xf32> -> vector<16x32xf32>
    %c416 = arith.constant 416 : index
    %c0_68 = arith.constant 0 : index
    %183 = vector.load %arg1[%c416, %c0_68] : memref<632x128xf32, #tpu.memory_space<vmem>>, vector<32x32xf32>
    %cst_69 = arith.constant dense<0.000000e+00> : vector<16x32xf32>
    %184 = tpu.matmul %182, %183, %cst_69 {dimension_numbers = #tpu.dot_dimension_numbers<[1], [0], [0], [1], [0, 0, 1, 1], [], []>} : vector<16x32xf32>, vector<32x32xf32>, vector<16x32xf32> -> vector<16x32xf32>
    %c622 = arith.constant 622 : index
    %c0_70 = arith.constant 0 : index
    %185 = vector.load %arg1[%c622, %c0_70] : memref<632x128xf32, #tpu.memory_space<vmem>>, vector<1x32xf32>
    %186 = vector.broadcast %185 : vector<1x32xf32> to vector<16x32xf32>
    %187 = arith.addf %184, %186 : vector<16x32xf32>
    %188 = arith.addf %128, %187 : vector<16x32xf32>
    %c623 = arith.constant 623 : index
    %c0_71 = arith.constant 0 : index
    %189 = vector.load %arg1[%c623, %c0_71] : memref<632x128xf32, #tpu.memory_space<vmem>>, vector<1x32xf32>
    %c624 = arith.constant 624 : index
    %c0_72 = arith.constant 0 : index
    %190 = vector.load %arg1[%c624, %c0_72] : memref<632x128xf32, #tpu.memory_space<vmem>>, vector<1x32xf32>
    %cst_73 = arith.constant dense<0.000000e+00> : vector<16xf32>
    %191 = vector.multi_reduction <add>, %188, %cst_73 [1] : vector<16x32xf32> to vector<16xf32>
    %192 = vector.shape_cast %191 : vector<16xf32> to vector<16x1xf32>
    %cst_74 = arith.constant 3.200000e+01 : f32
    %193 = vector.broadcast %cst_74 : f32 to vector<16x1xf32>
    %194 = arith.divf %192, %193 : vector<16x1xf32>
    %195 = arith.mulf %188, %188 : vector<16x32xf32>
    %cst_75 = arith.constant dense<0.000000e+00> : vector<16xf32>
    %196 = vector.multi_reduction <add>, %195, %cst_75 [1] : vector<16x32xf32> to vector<16xf32>
    %197 = vector.shape_cast %196 : vector<16xf32> to vector<16x1xf32>
    %cst_76 = arith.constant 3.200000e+01 : f32
    %198 = vector.broadcast %cst_76 : f32 to vector<16x1xf32>
    %199 = arith.divf %197, %198 : vector<16x1xf32>
    %200 = arith.mulf %194, %194 : vector<16x1xf32>
    %201 = arith.subf %199, %200 : vector<16x1xf32>
    %202 = vector.broadcast %194 : vector<16x1xf32> to vector<16x32xf32>
    %203 = arith.subf %188, %202 : vector<16x32xf32>
    %cst_77 = arith.constant 9.99999974E-6 : f32
    %204 = vector.broadcast %cst_77 : f32 to vector<16x1xf32>
    %205 = arith.addf %201, %204 : vector<16x1xf32>
    %206 = math.rsqrt %205 : vector<16x1xf32>
    %207 = vector.broadcast %206 : vector<16x1xf32> to vector<16x32xf32>
    %208 = arith.mulf %203, %207 : vector<16x32xf32>
    %209 = vector.broadcast %189 : vector<1x32xf32> to vector<16x32xf32>
    %210 = arith.mulf %208, %209 : vector<16x32xf32>
    %211 = vector.broadcast %190 : vector<1x32xf32> to vector<16x32xf32>
    %212 = arith.addf %210, %211 : vector<16x32xf32>
    %c448 = arith.constant 448 : index
    %c0_78 = arith.constant 0 : index
    %213 = vector.load %arg1[%c448, %c0_78] : memref<632x128xf32, #tpu.memory_space<vmem>>, vector<32x64xf32>
    %cst_79 = arith.constant dense<0.000000e+00> : vector<16x64xf32>
    %214 = tpu.matmul %212, %213, %cst_79 {dimension_numbers = #tpu.dot_dimension_numbers<[1], [0], [0], [1], [0, 0, 1, 1], [], []>} : vector<16x32xf32>, vector<32x64xf32>, vector<16x64xf32> -> vector<16x64xf32>
    %c625 = arith.constant 625 : index
    %c0_80 = arith.constant 0 : index
    %215 = vector.load %arg1[%c625, %c0_80] : memref<632x128xf32, #tpu.memory_space<vmem>>, vector<1x64xf32>
    %216 = vector.broadcast %215 : vector<1x64xf32> to vector<16x64xf32>
    %217 = arith.addf %214, %216 : vector<16x64xf32>
    %cst_81 = arith.constant 0.000000e+00 : f32
    %218 = vector.broadcast %cst_81 : f32 to vector<16x64xf32>
    %219 = arith.maximumf %217, %218 : vector<16x64xf32>
    %c480 = arith.constant 480 : index
    %c0_82 = arith.constant 0 : index
    %220 = vector.load %arg1[%c480, %c0_82] : memref<632x128xf32, #tpu.memory_space<vmem>>, vector<64x32xf32>
    %cst_83 = arith.constant dense<0.000000e+00> : vector<16x32xf32>
    %221 = tpu.matmul %219, %220, %cst_83 {dimension_numbers = #tpu.dot_dimension_numbers<[1], [0], [0], [1], [0, 0, 1, 1], [], []>} : vector<16x64xf32>, vector<64x32xf32>, vector<16x32xf32> -> vector<16x32xf32>
    %c626 = arith.constant 626 : index
    %c0_84 = arith.constant 0 : index
    %222 = vector.load %arg1[%c626, %c0_84] : memref<632x128xf32, #tpu.memory_space<vmem>>, vector<1x32xf32>
    %223 = vector.broadcast %222 : vector<1x32xf32> to vector<16x32xf32>
    %224 = arith.addf %221, %223 : vector<16x32xf32>
    %225 = arith.addf %212, %224 : vector<16x32xf32>
    %c627 = arith.constant 627 : index
    %c0_85 = arith.constant 0 : index
    %226 = vector.load %arg1[%c627, %c0_85] : memref<632x128xf32, #tpu.memory_space<vmem>>, vector<1x32xf32>
    %c628 = arith.constant 628 : index
    %c0_86 = arith.constant 0 : index
    %227 = vector.load %arg1[%c628, %c0_86] : memref<632x128xf32, #tpu.memory_space<vmem>>, vector<1x32xf32>
    %cst_87 = arith.constant dense<0.000000e+00> : vector<16xf32>
    %228 = vector.multi_reduction <add>, %225, %cst_87 [1] : vector<16x32xf32> to vector<16xf32>
    %229 = vector.shape_cast %228 : vector<16xf32> to vector<16x1xf32>
    %cst_88 = arith.constant 3.200000e+01 : f32
    %230 = vector.broadcast %cst_88 : f32 to vector<16x1xf32>
    %231 = arith.divf %229, %230 : vector<16x1xf32>
    %232 = arith.mulf %225, %225 : vector<16x32xf32>
    %cst_89 = arith.constant dense<0.000000e+00> : vector<16xf32>
    %233 = vector.multi_reduction <add>, %232, %cst_89 [1] : vector<16x32xf32> to vector<16xf32>
    %234 = vector.shape_cast %233 : vector<16xf32> to vector<16x1xf32>
    %cst_90 = arith.constant 3.200000e+01 : f32
    %235 = vector.broadcast %cst_90 : f32 to vector<16x1xf32>
    %236 = arith.divf %234, %235 : vector<16x1xf32>
    %237 = arith.mulf %231, %231 : vector<16x1xf32>
    %238 = arith.subf %236, %237 : vector<16x1xf32>
    %239 = vector.broadcast %231 : vector<16x1xf32> to vector<16x32xf32>
    %240 = arith.subf %225, %239 : vector<16x32xf32>
    %cst_91 = arith.constant 9.99999974E-6 : f32
    %241 = vector.broadcast %cst_91 : f32 to vector<16x1xf32>
    %242 = arith.addf %238, %241 : vector<16x1xf32>
    %243 = math.rsqrt %242 : vector<16x1xf32>
    %244 = vector.broadcast %243 : vector<16x1xf32> to vector<16x32xf32>
    %245 = arith.mulf %240, %244 : vector<16x32xf32>
    %246 = vector.broadcast %226 : vector<1x32xf32> to vector<16x32xf32>
    %247 = arith.mulf %245, %246 : vector<16x32xf32>
    %248 = vector.broadcast %227 : vector<1x32xf32> to vector<16x32xf32>
    %249 = arith.addf %247, %248 : vector<16x32xf32>
    %c544 = arith.constant 544 : index
    %c0_92 = arith.constant 0 : index
    %250 = vector.load %arg1[%c544, %c0_92] : memref<632x128xf32, #tpu.memory_space<vmem>>, vector<32x32xf32>
    %cst_93 = arith.constant dense<0.000000e+00> : vector<16x32xf32>
    %251 = tpu.matmul %249, %250, %cst_93 {dimension_numbers = #tpu.dot_dimension_numbers<[1], [0], [0], [1], [0, 0, 1, 1], [], []>} : vector<16x32xf32>, vector<32x32xf32>, vector<16x32xf32> -> vector<16x32xf32>
    %c629 = arith.constant 629 : index
    %c0_94 = arith.constant 0 : index
    %252 = vector.load %arg1[%c629, %c0_94] : memref<632x128xf32, #tpu.memory_space<vmem>>, vector<1x32xf32>
    %253 = vector.broadcast %252 : vector<1x32xf32> to vector<16x32xf32>
    %254 = arith.addf %251, %253 : vector<16x32xf32>
    %cst_95 = arith.constant 0.000000e+00 : f32
    %255 = vector.broadcast %cst_95 : f32 to vector<16x32xf32>
    %256 = arith.maximumf %254, %255 : vector<16x32xf32>
    %c576 = arith.constant 576 : index
    %c0_96 = arith.constant 0 : index
    %257 = vector.load %arg1[%c576, %c0_96] : memref<632x128xf32, #tpu.memory_space<vmem>>, vector<32x128xf32>
    %cst_97 = arith.constant dense<0.000000e+00> : vector<16x128xf32>
    %258 = tpu.matmul %256, %257, %cst_97 {dimension_numbers = #tpu.dot_dimension_numbers<[1], [0], [0], [1], [0, 0, 1, 1], [], []>} : vector<16x32xf32>, vector<32x128xf32>, vector<16x128xf32> -> vector<16x128xf32>
    %c630 = arith.constant 630 : index
    %c0_98 = arith.constant 0 : index
    %259 = vector.load %arg1[%c630, %c0_98] : memref<632x128xf32, #tpu.memory_space<vmem>>, vector<1x128xf32>
    %260 = vector.broadcast %259 : vector<1x128xf32> to vector<16x128xf32>
    %261 = arith.addf %258, %260 : vector<16x128xf32>
    %c0_99 = arith.constant 0 : index
    %c0_100 = arith.constant 0 : index
    %262 = vector.load %arg2[%c0_99, %c0_100] : memref<16x128xf32, #tpu.memory_space<vmem>>, vector<16x128xf32>
    tpu.vector_store %arg2[%c0_99, %c0_100], %261 {strides = array<i32>} : memref<16x128xf32, #tpu.memory_space<vmem>>, vector<16x128xf32>,
    return
  }
}

</mosaic_0001>

<bundles_post_ra>
// kernel: stepwise_predictor.1
= control target key start
LH: loop header
LB: loop body
LE: loop exit
PB: predicated region body
PF: predicated region fallthrough
CT: control target
= control target key end

     0   :  { %7 = vsyncpa [#allocation3], 0  ;;  %s1341_s12 = smov [#allocation2]   ;;  %s1342_s14 = smov 128   ;;  %s1589_s0 = inlined_call_operand.vmem [shape: f32[16,32], index: 0, kind: input, shape index: {}]   ;;  %s1590_s1 = inlined_call_operand.hbm [shape: f32[632,128], index: 1, kind: input, shape index: {}]   ;;  %s1591_s2 = inlined_call_operand.vmem [shape: f32[16,128], index: 2, kind: output, shape index: {}]  }
   0x1   :  { %s14_s11 = sshll.u32 %s1590_s1, 4  ;;  %s16_s13 = sshll.u32 %s1341_s12, 4  ;;  %s15_s11 = int_to_ptr.hbm [resolvable:$true] %s14_s11  ;;  %s17_s13 = int_to_ptr.vmem [resolvable:$true] %s16_s13 }
   0x2   :  { %s1343_s15 = smov 8  }
   0x3   :  { %22 = dma.hbm_to_vmem [thread:$0]  %s15_s11, 10112, %s17_s13, [#allocation3], %s1342_s14, %s1342_s14, %s1343_s15  }
   0x4   :  { %1339 = dma.done.wait [#allocation3], 10112  }
   0x5   :  { %1340 = vsyncadd [#allocation3], 4294957184  ;;  %v40_v0 = vld [vmem:[#allocation2 + $0x58] sm:$0xff]  ;;  %v39_v1 = vld [vmem:[#allocation2 + $0x50] sm:$0xff]  ;;  %vm43_vm0 = vcmask 261120   ;;  %vm509_vm8 = vcmask 523264  }
   0x6   :  { %62 = vmatpush.msra.mxu0 %v40_v0  ;;  %v38_v2 = vld [vmem:[#allocation2 + $0x48] sm:$0xff]  ;;  %v37_v3 = vld [vmem:[#allocation2 + $0x40] sm:$0xff]  ;;  %v76_v4 = vld [vmem:[#allocation2 + $0x78] sm:$0xff] }
   0x7   :  { %v140_v5 = vld [vmem:[#allocation2 + $0xb8] sm:$0xff]  ;;  %v75_v6 = vld [vmem:[#allocation2 + $0x70] sm:$0xff]  ;;  %v35_v7 = vld [vmem:[%s1589_s0] sm:$0xff]  ;;  %97 = vmatpush.msra.mxu1 %v76_v4  ;;  %1250 = vmatpush.msra.mxu2 %v76_v4 }
   0x8   :  { %63 = vmatpush.msra.mxu0 %v39_v1  ;;  %v139_v8 = vld [vmem:[#allocation2 + $0xb0] sm:$0xff]  ;;  %155 = vmatpush.msra.mxu3 %v140_v5  ;;  %v36_v9 = vld [vmem:[%s1589_s0 + $0x8] sm:$0xff]  ;;  %v73_v12 = vld [vmem:[#allocation2 + $0x60] sm:$0xff] }
   0x9   :  { %98 = vmatpush.msra.mxu1 %v75_v6  ;;  %1251 = vmatpush.msra.mxu2 %v75_v6  ;;  %v74_v10 = vld [vmem:[#allocation2 + $0x68] sm:$0xff]  ;;  %v137_v13 = vld [vmem:[#allocation2 + $0xa0] sm:$0xff]  ;;  %v111_v14 = vld [vmem:[#allocation2 + $0x98] sm:$0xff] }
   0xa   :  { %64 = vmatpush.msra.mxu0 %v38_v2  ;;  %156 = vmatpush.msra.mxu3 %v139_v8  ;;  %v138_v11 = vld [vmem:[#allocation2 + $0xa8] sm:$0xff]  ;;  %v110_v15 = vld [vmem:[#allocation2 + $0x90] sm:$0xff]  ;;  %v108_v17 = vld [vmem:[#allocation2 + $0x80] sm:$0xff] }
   0xb   :  { %99 = vmatpush.msra.mxu1 %v74_v10  ;;  %1252 = vmatpush.msra.mxu2 %v74_v10  ;;  %v109_v16 = vld [vmem:[#allocation2 + $0x88] sm:$0xff]  ;;  %v1258_v18 = vld [vmem:[#allocation2 + $0x260] ss:$0 sm:$0xff]  ;;  %v1387_v23 = vld [vmem:[#allocation2 + $0x38] sm:$0xff] }
   0xc   :  { %65 = vmatpush.msra.mxu0 %v37_v3  ;;  %157 = vmatpush.msra.mxu3 %v138_v11  ;;  %v1390_v24 = vld [vmem:[#allocation2 + $0x30] sm:$0xff]  ;;  %v1393_v25 = vld [vmem:[#allocation2 + $0x28] sm:$0xff]  ;;  %v1396_v26 = vld [vmem:[#allocation2 + $0x20] sm:$0xff] }
   0xd   :  { %1192 = vmatmul.msk.f32.vlgmr.msra.gmra.mxu0 %vm43_vm0, %v35_v7  ;;  %100 = vmatpush.msra.mxu1 %v73_v12  ;;  %v1260_v27 = vld [vmem:[#allocation2 + $0x263] ss:$0 sm:$0xff]  ;;  %v1399_v29 = vld [vmem:[#allocation2 + $0x18] sm:$0xff]  ;;  %v1401_v31 = vld [vmem:[#allocation2 + $0x10] sm:$0xff] }
   0xe   :  { %158 = vmatpush.msra.mxu3 %v137_v13  ;;  %1253 = vmatpush.msra.mxu2 %v73_v12  ;;  %v1404_v33 = vld [vmem:[#allocation2 + $0x8] sm:$0xff]  ;;  %v1407_v35 = vld [vmem:[#allocation2] sm:$0xff]  ;;  %v365_v12 = vld [vmem:[#allocation2 + $0xd8] sm:$0xff] }
   0xf   :  { %231 = vmatpush.msrb.mxu1 %v1387_v23  ;;  %v1261_v43 = vld [vmem:[#allocation2 + $0x262] ss:$0 sm:$0xff]  ;;  %v1259_v54 = vld [vmem:[#allocation2 + $0x261] ss:$0 sm:$0xff]  ;;  %v364_v13 = vld [vmem:[#allocation2 + $0xd0] sm:$0xff] }
  0x10   :  { %126 = vmatpush.msrb.mxu2 %v111_v14  ;;  %v363_v14 = vld [vmem:[#allocation2 + $0xc8] sm:$0xff] }
  0x11   :  { %232 = vmatpush.msrb.mxu1 %v1390_v24 }
  0x12   :  { %127 = vmatpush.msrb.mxu2 %v110_v15 }
  0x13   :  { %233 = vmatpush.msrb.mxu1 %v1393_v25 }
  0x14   :  { %128 = vmatpush.msrb.mxu2 %v109_v16 }
  0x15   :  { %1193 = vmatmul.msk.f32.gmra.mxu0 %vm43_vm0, %v36_v9  ;;  %234 = vmatpush.msrb.mxu1 %v1396_v26 }
  0x16   :  { %129 = vmatpush.msrb.mxu2 %v108_v17 }
  0x8a   :  { %v67_v19 = vpop.f32.mrf.mxu0 }
  0x8b   :  { %v1371_v20 = vadd.f32 %v1258_v18, %v67_v19 }
  0x8d   :  { %1194 = vmatmul.msk.f32.vlgmr.msra.gmra.mxu1 %vm43_vm0, %v1371_v20  ;;  %1198 = vmatmul.msk.f32.vlgmr.msra.gmra.mxu3 %vm43_vm0, %v1371_v20 }
  0x92   :  { %v70_v21 = vpop.f32.mrf.mxu0 }
  0x93   :  { %v1377_v22 = vadd.f32 %v1258_v18, %v70_v21 }
  0x95   :  { %1195 = vmatmul.msk.f32.vlgmr.msra.gmra.mxu2 %vm43_vm0, %v1377_v22  ;;  %1199 = vmatmul.msk.f32.gmra.mxu3 %vm43_vm0, %v1377_v22 }
  0x9d   :  { %1196 = vmatmul.msk.f32.vlgmr.msrb.gmra.mxu2 %vm43_vm0, %v1371_v20 }
  0xa5   :  { %1197 = vmatmul.msk.f32.gmra.mxu2 %vm43_vm0, %v1377_v22 }
 0x10a   :  { %v102_v55 = vpop.f32.mrf.mxu1 }
 0x10b   :  { %v103_v58 = vadd.f32 %v1259_v54, %v102_v55  ;;  %v463_v55 = vld [vmem:[#allocation2 + $0xe8] sm:$0xff] }
 0x110   :  { %v160_v28 = vpop.f32.mrf.mxu3 }
 0x111   :  { %v161_v30 = vadd.f32 %v1260_v27, %v160_v28 }
 0x113   :  { %v173_v32 = vmul.f32 %v161_v30, %v1399_v29  ;;  %v172_v34 = vmul.f32 %v161_v30, %v1401_v31  ;;  %v171_v36 = vmul.f32 %v161_v30, %v1404_v33  ;;  %v170_v40 = vmul.f32 %v161_v30, %v1407_v35 }
 0x115   :  { %256 = vmatpush.msra.mxu2 %v173_v32  ;;  %v1262_v32 = vld [vmem:[#allocation2 + $0x264] ss:$0 sm:$0xff] }
 0x117   :  { %257 = vmatpush.msra.mxu2 %v172_v34 }
 0x118   :  { %v105_v37 = vpop.f32.mrf.mxu2  ;;  %v163_v38 = vpop.f32.mrf.mxu3 }
 0x119   :  { %v164_v39 = vadd.f32 %v1260_v27, %v163_v38  ;;  %258 = vmatpush.msra.mxu2 %v171_v36  ;;  %v106_v61 = vadd.f32 %v1259_v54, %v105_v37  ;;  %v362_v27 = vld [vmem:[#allocation2 + $0xc0] sm:$0xff] }
 0x11b   :  { %259 = vmatpush.msra.mxu2 %v170_v40  ;;  %v271_v41 = vmul.f32 %v164_v39, %v1399_v29  ;;  %v270_v42 = vmul.f32 %v164_v39, %v1401_v31  ;;  %v269_v44 = vmul.f32 %v164_v39, %v1404_v33  ;;  %v268_v47 = vmul.f32 %v164_v39, %v1407_v35 }
 0x11d   :  { %354 = vmatpush.msra.mxu1 %v271_v41  ;;  %386 = vmatpush.msrb.mxu2 %v365_v12 }
 0x11f   :  { %355 = vmatpush.msra.mxu1 %v270_v42  ;;  %387 = vmatpush.msrb.mxu2 %v364_v13 }
 0x120   :  { %v131_v45 = vpop.f32.mrf.mxu2 }
 0x121   :  { %v132_v46 = vadd.f32 %v1261_v43, %v131_v45  ;;  %356 = vmatpush.msra.mxu1 %v269_v44  ;;  %388 = vmatpush.msrb.mxu2 %v363_v14 }
 0x123   :  { %357 = vmatpush.msra.mxu1 %v268_v47  ;;  %v169_v48 = vmul.f32 %v132_v46, %v1399_v29  ;;  %v168_v49 = vmul.f32 %v132_v46, %v1401_v31  ;;  %v167_v52 = vmul.f32 %v132_v46, %v1404_v33  ;;  %v166_v56 = vmul.f32 %v132_v46, %v1407_v35 }
 0x124   :  { %389 = vmatpush.msrb.mxu2 %v362_v27  ;;  %v1344_v46 = vmov 32.0  }
 0x125   :  { %1200 = vmatpush.xpose.msk.msrb.mxu0 %vm43_vm0, %v169_v48 }
 0x128   :  { %v134_v50 = vpop.f32.mrf.mxu2 }
 0x129   :  { %v135_v51 = vadd.f32 %v1261_v43, %v134_v50  ;;  %1201 = vmatpush.xpose.msk.msrb.mxu0 %vm43_vm0, %v168_v49 }
 0x12b   :  { %v267_v53 = vmul.f32 %v135_v51, %v1399_v29  ;;  %v266_v57 = vmul.f32 %v135_v51, %v1401_v31  ;;  %v265_v59 = vmul.f32 %v135_v51, %v1404_v33  ;;  %v264_v60 = vmul.f32 %v135_v51, %v1407_v35  ;;  %v465_v51 = vld [vmem:[#allocation2 + $0xf8] sm:$0xff] }
 0x12d   :  { %1202 = vmatpush.xpose.msk.msrb.mxu0 %vm43_vm0, %v167_v52  ;;  %1207 = vmatpush.xpose.msk.msrb.mxu3 %vm43_vm0, %v267_v53  ;;  %v464_v53 = vld [vmem:[#allocation2 + $0xf0] sm:$0xff] }
 0x131   :  { %1203 = vmatpush.xpose.msk.msrb.mxu0 %vm43_vm0, %v166_v56  ;;  %1208 = vmatpush.xpose.msk.msrb.mxu3 %vm43_vm0, %v266_v57  ;;  %v462_v57 = vld [vmem:[#allocation2 + $0xe0] sm:$0xff] }
 0x134   :  { %1204 = vmatmul.msk.f32.vlgmr.msrb.gmra.mxu0 %vm43_vm0, %v103_v58 }
 0x135   :  { %329 = vmatpush.msra.mxu0 %v1387_v23  ;;  %1209 = vmatpush.xpose.msk.msrb.mxu3 %vm43_vm0, %v265_v59 }
 0x137   :  { %330 = vmatpush.msra.mxu0 %v1390_v24 }
 0x139   :  { %331 = vmatpush.msra.mxu0 %v1393_v25  ;;  %1210 = vmatpush.xpose.msk.msrb.mxu3 %vm43_vm0, %v264_v60 }
 0x13b   :  { %332 = vmatpush.msra.mxu0 %v1396_v26 }
 0x13c   :  { %1211 = vmatmul.msk.f32.vlgmr.msrb.gmra.mxu3 %vm43_vm0, %v106_v61 }
 0x13d   :  { %486 = vmatpush.msra.mxu3 %v465_v51 }
 0x13f   :  { %487 = vmatpush.msra.mxu3 %v464_v53  ;;  %v1266_v53 = vld [vmem:[#allocation2 + $0x268] ss:$0 sm:$0xff] }
 0x141   :  { %488 = vmatpush.msra.mxu3 %v463_v55 }
 0x143   :  { %489 = vmatpush.msra.mxu3 %v462_v57 }
 0x1b1   :  { %v206_v62 = vpop.f32.mrf.mxu0 }
 0x1b2   :  { %v209_v63 = vmul.f32 0.35355338, %v206_v62 }
 0x1b4   :  { %v210_v0 = vsel %vm43_vm0, %v209_v63, -inf }
 0x1b5   :  { %211 = vmax.xlane.f32.xlu0 %v210_v0 }
 0x1bf   :  { %v304_v1 = vpop.f32.mrf.mxu3 }
 0x1c0   :  { %v307_v2 = vmul.f32 0.35355338, %v304_v1  ;;  %v506_v1 = vld [vmem:[#allocation2 + $0x138] sm:$0xff] }
 0x1c1   :  { %524 = vmatpush.msrb.mxu0 %v506_v1 }
 0x1c2   :  { %v308_v3 = vsel %vm43_vm0, %v307_v2, -inf }
 0x1c3   :  { %309 = vmax.xlane.f32.xlu0 %v308_v3 }
 0x228   :  { %v212_v4 = vpop.xlane.xlu0 %211 }
 0x229   :  { %v213_v5 = vsub.f32 %v209_v63, %v212_v4 }
 0x22b   :  { %v214_v6 = vmul.f32 1.442695, %v213_v5 }
 0x22d   :  { %1281 = vpow2.f32 %v214_v6  ;;  %v504_v6 = vld [vmem:[#allocation2 + $0x128] sm:$0xff] }
 0x233   :  { %v1282_v7 = vpop.eup %1281 }
 0x234   :  { %1205 = vmatmul.msk.f32.vlgmr.msrb.gmra.mxu1 %vm43_vm0, %v1282_v7 }
 0x236   :  { %v310_v8 = vpop.xlane.xlu0 %309 }
 0x237   :  { %v311_v9 = vsub.f32 %v307_v2, %v310_v8  ;;  %v505_v2 = vld [vmem:[#allocation2 + $0x130] sm:$0xff]  ;;  %v503_v8 = vld [vmem:[#allocation2 + $0x120] sm:$0xff] }
 0x238   :  { %525 = vmatpush.msrb.mxu0 %v505_v2 }
 0x239   :  { %v312_v10 = vmul.f32 1.442695, %v311_v9 }
 0x23a   :  { %526 = vmatpush.msrb.mxu0 %v504_v6  ;;  %v634_v6 = vld [vmem:[#allocation2 + $0x170] sm:$0xff] }
 0x23b   :  { %1283 = vpow2.f32 %v312_v10 }
 0x23c   :  { %527 = vmatpush.msrb.mxu0 %v503_v8  ;;  %v663_v8 = vld [vmem:[#allocation2 + $0x190] sm:$0xff] }
 0x241   :  { %v1284_v11 = vpop.eup %1283 }
 0x242   :  { %1212 = vmatmul.msk.f32.vlgmr.msra.gmra.mxu0 %vm43_vm0, %v1284_v11 }
 0x2b1   :  { %v236_v15 = vpop.f32.mrf.mxu1 }
 0x2b2   :  { %1285 = vrcp.f32 %v236_v15 }
 0x2b8   :  { %v1286_v16 = vpop.eup %1285 }
 0x2b9   :  { %v240_v17 = vmul.f32 %v1286_v16, %v1282_v7 }
 0x2bb   :  { %1206 = vmatmul.msk.f32.vlgmr.msra.gmra.mxu2 %vm43_vm0, %v240_v17 }
 0x2bf   :  { %v334_v18 = vpop.f32.mrf.mxu0 }
 0x2c0   :  { %1287 = vrcp.f32 %v334_v18 }
 0x2c1   :  { %1289 = vrcp.f32 %v1344_v46  ;;  %v500_v46 = vld [vmem:[#allocation2 + $0x108] sm:$0xff] }
 0x2c6   :  { %v1288_v19 = vpop.eup %1287 }
 0x2c7   :  { %v338_v21 = vmul.f32 %v1288_v19, %v1284_v11  ;;  %v1290_v47 = vpop.eup %1289  ;;  %v502_v11 = vld [vmem:[#allocation2 + $0x118] sm:$0xff] }
 0x2c8   :  { %v408_v48 = vmul.f32 32.0, %v1290_v47  ;;  %vm412_vm1 = vweird.f32 %v1290_v47  ;;  %528 = vmatpush.msrb.mxu0 %v502_v11  ;;  %v662_v11 = vld [vmem:[#allocation2 + $0x188] sm:$0xff] }
 0x2c9   :  { %1213 = vmatmul.msk.f32.vlgmr.msra.gmra.mxu1 %vm43_vm0, %v338_v21  ;;  %v1263_v21 = vld [vmem:[#allocation2 + $0x265] ss:$0 sm:$0xff] }
 0x2ca   :  { %v409_v49 = vsub.f32 1.0, %v408_v48 }
 0x33e   :  { %v261_v28 = vpop.f32.mrf.mxu2 }
 0x33f   :  { %1214 = vmatmul.msk.f32.vlgmr.msrb.gmra.mxu2 %vm43_vm0, %v261_v28 }
 0x346   :  { %v359_v30 = vpop.f32.mrf.mxu1 }
 0x347   :  { %1215 = vmatmul.msk.f32.gmra.mxu2 %vm43_vm0, %v359_v30 }
 0x3c2   :  { %v391_v34 = vpop.f32.mrf.mxu2 }
 0x3c3   :  { %v392_v36 = vadd.f32 %v1262_v32, %v391_v34 }
 0x3c5   :  { %v1446_v37 = vadd.f32 %v392_v36, %v1371_v20 }
 0x3c7   :  { %v401_v38 = vsel %vm43_vm0, %v1446_v37, 0.0  ;;  %v416_v41 = vmul.f32 %v1446_v37, %v1446_v37 }
 0x3c8   :  { %402 = vadd.xlane.f32.xlu1 %v401_v38 }
 0x3c9   :  { %v418_v43 = vsel %vm43_vm0, %v416_v41, 0.0 }
 0x3ca   :  { %v394_v39 = vpop.f32.mrf.mxu2 }
 0x3cb   :  { %v395_v40 = vadd.f32 %v1262_v32, %v394_v39  ;;  %v1264_v32 = vld [vmem:[#allocation2 + $0x266] ss:$0 sm:$0xff] }
 0x3cd   :  { %v1453_v42 = vadd.f32 %v395_v40, %v1377_v22  ;;  %v410_v22 = vmul.f32 %v1290_v47, %v409_v49 }
 0x3cf   :  { %v404_v44 = vsel %vm43_vm0, %v1453_v42, 0.0  ;;  %v417_v20 = vmul.f32 %v1453_v42, %v1453_v42  ;;  %v411_v50 = vadd.f32 %v1290_v47, %v410_v22 }
 0x3d0   :  { %419 = vadd.xlane.f32.xlu1 %v418_v43  ;;  %405 = vadd.xlane.f32.xlu2 %v404_v44 }
 0x3d1   :  { %v421_v45 = vsel %vm43_vm0, %v417_v20, 0.0  ;;  %v1461_v54 = vsel %vm412_vm1, %v1290_v47, %v411_v50  ;;  %v499_v47 = vld [vmem:[#allocation2 + $0x100] sm:$0xff] }
 0x3d8   :  { %422 = vadd.xlane.f32.xlu2 %v421_v45  ;;  %v501_v45 = vld [vmem:[#allocation2 + $0x110] sm:$0xff] }
 0x3d9   :  { %529 = vmatpush.msrb.mxu0 %v501_v45 }
 0x3db   :  { %530 = vmatpush.msrb.mxu0 %v500_v46 }
 0x3dd   :  { %531 = vmatpush.msrb.mxu0 %v499_v47 }
 0x3df   :  { %755 = vmatpush.msra.mxu0 %v1387_v23 }
 0x3e1   :  { %756 = vmatpush.msra.mxu0 %v1390_v24 }
 0x3e3   :  { %757 = vmatpush.msra.mxu0 %v1393_v25 }
 0x3e5   :  { %758 = vmatpush.msra.mxu0 %v1396_v26 }
 0x43b   :  { %v403_v52 = vpop.xlane.xlu1 %402 }
 0x43c   :  { %v414_v56 = vmul.f32 %v1461_v54, %v403_v52 }
 0x43e   :  { %v426_v60 = vmul.f32 %v414_v56, %v414_v56  ;;  %v430_v19 = vsub.f32 %v1446_v37, %v414_v56 }
 0x443   :  { %v420_v58 = vpop.xlane.xlu1 %419  ;;  %v406_v59 = vpop.xlane.xlu2 %405 }
 0x444   :  { %v424_v61 = vmul.f32 %v420_v58, %v1461_v54  ;;  %v415_v0 = vmul.f32 %v1461_v54, %v406_v59 }
 0x446   :  { %v428_v62 = vsub.f32 %v424_v61, %v426_v60  ;;  %v427_v4 = vmul.f32 %v415_v0, %v415_v0  ;;  %v431_v41 = vsub.f32 %v1453_v42, %v415_v0  ;;  %v1265_v42 = vld [vmem:[#allocation2 + $0x267] ss:$0 sm:$0xff] }
 0x448   :  { %v432_v63 = vadd.f32 1e-05, %v428_v62 }
 0x44a   :  { %1291 = vrsqrt.f32 %v432_v63  ;;  %vm440_vm3 = vweird.f32 %v432_v63 }
 0x44b   :  { %v423_v3 = vpop.xlane.xlu2 %422 }
 0x44c   :  { %v425_v5 = vmul.f32 %v423_v3, %v1461_v54  ;;  %v635_v3 = vld [vmem:[#allocation2 + $0x178] sm:$0xff] }
 0x44d   :  { %650 = vmatpush.msra.mxu2 %v635_v3 }
 0x44e   :  { %v429_v7 = vsub.f32 %v425_v5, %v427_v4  ;;  %v600_v4 = vld [vmem:[#allocation2 + $0x158] sm:$0xff] }
 0x44f   :  { %v664_v5 = vld [vmem:[#allocation2 + $0x198] sm:$0xff]  ;;  %621 = vmatpush.msrb.mxu1 %v600_v4  ;;  %651 = vmatpush.msra.mxu2 %v634_v6 }
 0x450   :  { %v1292_v9 = vpop.eup %1291  ;;  %v433_v10 = vadd.f32 1e-05, %v429_v7  ;;  %679 = vmatpush.msrb.mxu3 %v664_v5  ;;  %v599_v7 = vld [vmem:[#allocation2 + $0x150] sm:$0xff] }
 0x451   :  { %v435_v12 = vmul.f32 %v1292_v9, %v432_v63  ;;  %vm441_vm2 = vweird.f32 %v1292_v9  ;;  %622 = vmatpush.msrb.mxu1 %v599_v7 }
 0x452   :  { %1293 = vrsqrt.f32 %v433_v10  ;;  %vm442_vm4 = vmor %vm440_vm3, %vm441_vm2  ;;  %vm450_vm6 = vweird.f32 %v433_v10  ;;  %680 = vmatpush.msrb.mxu3 %v663_v8 }
 0x453   :  { %v436_v13 = vmul.f32 %v1292_v9, %v435_v12  ;;  %v632_v12 = vld [vmem:[#allocation2 + $0x160] sm:$0xff] }
 0x454   :  { %681 = vmatpush.msrb.mxu3 %v662_v11 }
 0x455   :  { %v437_v14 = vmul.f32 0.5, %v436_v13  ;;  %v597_v13 = vld [vmem:[#allocation2 + $0x140] sm:$0xff] }
 0x457   :  { %v438_v15 = vsub.f32 1.5, %v437_v14  ;;  %v661_v14 = vld [vmem:[#allocation2 + $0x180] sm:$0xff] }
 0x458   :  { %v1294_v16 = vpop.eup %1293  ;;  %682 = vmatpush.msrb.mxu3 %v661_v14 }
 0x459   :  { %v439_v17 = vmul.f32 %v1292_v9, %v438_v15  ;;  %v445_v18 = vmul.f32 %v1294_v16, %v433_v10  ;;  %vm451_vm5 = vweird.f32 %v1294_v16  ;;  %v598_v10 = vld [vmem:[#allocation2 + $0x148] sm:$0xff] }
 0x45a   :  { %vm452_vm7 = vmor %vm450_vm6, %vm451_vm5  ;;  %623 = vmatpush.msrb.mxu1 %v598_v10  ;;  %v1269_v10 = vld [vmem:[#allocation2 + $0x26b] ss:$0 sm:$0xff] }
 0x45b   :  { %v443_v27 = vsel %vm442_vm4, %v1292_v9, %v439_v17  ;;  %v446_v28 = vmul.f32 %v1294_v16, %v445_v18  ;;  %v633_v9 = vld [vmem:[#allocation2 + $0x168] sm:$0xff] }
 0x45c   :  { %v454_v30 = vmul.f32 %v443_v27, %v430_v19  ;;  %652 = vmatpush.msra.mxu2 %v633_v9  ;;  %624 = vmatpush.msrb.mxu1 %v597_v13 }
 0x45d   :  { %v447_v34 = vmul.f32 0.5, %v446_v28 }
 0x45e   :  { %v457_v36 = vmul.f32 %v1263_v21, %v454_v30  ;;  %653 = vmatpush.msra.mxu2 %v632_v12 }
 0x45f   :  { %v448_v38 = vsub.f32 1.5, %v447_v34 }
 0x460   :  { %v460_v39 = vadd.f32 %v1264_v32, %v457_v36 }
 0x461   :  { %v449_v40 = vmul.f32 %v1294_v16, %v448_v38 }
 0x462   :  { %1216 = vmatmul.msk.f32.vlgmr.msra.gmra.mxu3 %vm43_vm0, %v460_v39 }
 0x463   :  { %v453_v43 = vsel %vm452_vm7, %v1294_v16, %v449_v40  ;;  %853 = vmatpush.msra.mxu3 %v1387_v23 }
 0x464   :  { %v455_v37 = vmul.f32 %v453_v43, %v431_v41 }
 0x465   :  { %854 = vmatpush.msra.mxu3 %v1390_v24 }
 0x466   :  { %v458_v44 = vmul.f32 %v1263_v21, %v455_v37 }
 0x467   :  { %855 = vmatpush.msra.mxu3 %v1393_v25 }
 0x468   :  { %v461_v20 = vadd.f32 %v1264_v32, %v458_v44 }
 0x469   :  { %856 = vmatpush.msra.mxu3 %v1396_v26 }
 0x46a   :  { %1217 = vmatmul.msk.f32.gmra.mxu3 %vm43_vm0, %v461_v20 }
 0x4e5   :  { %v491_v48 = vpop.f32.mrf.mxu3 }
 0x4e6   :  { %v492_v49 = vadd.f32 %v1265_v42, %v491_v48 }
 0x4e8   :  { %v497_v22 = vmax.f32 %v492_v49, 0.0 }
 0x4ea   :  { %1218 = vmatmul.msk.f32.vlgmr.msrb.gmra.mxu0 %vm509_vm8, %v497_v22 }
 0x4ed   :  { %v494_v50 = vpop.f32.mrf.mxu3 }
 0x4ee   :  { %v495_v51 = vadd.f32 %v1265_v42, %v494_v50  ;;  %v1268_v42 = vld [vmem:[#allocation2 + $0x26a] ss:$0 sm:$0xff] }
 0x4f0   :  { %v498_v52 = vmax.f32 %v495_v51, 0.0 }
 0x4f2   :  { %1219 = vmatmul.msk.f32.gmra.mxu0 %vm509_vm8, %v498_v52 }
 0x567   :  { %v533_v55 = vpop.f32.mrf.mxu0 }
 0x568   :  { %v534_v56 = vadd.f32 %v1266_v53, %v533_v55 }
 0x56a   :  { %v1477_v57 = vadd.f32 %v534_v56, %v460_v39 }
 0x56c   :  { %v543_v58 = vsel %vm43_vm0, %v1477_v57, 0.0  ;;  %v551_v59 = vmul.f32 %v1477_v57, %v1477_v57 }
 0x56d   :  { %544 = vadd.xlane.f32.xlu0 %v543_v58  ;;  %v1270_v58 = vld [vmem:[#allocation2 + $0x26c] ss:$0 sm:$0xff] }
 0x56e   :  { %v553_v60 = vsel %vm43_vm0, %v551_v59, 0.0 }
 0x56f   :  { %554 = vadd.xlane.f32.xlu1 %v553_v60  ;;  %v536_v61 = vpop.f32.mrf.mxu0 }
 0x570   :  { %v537_v62 = vadd.f32 %v1266_v53, %v536_v61 }
 0x572   :  { %v1484_v63 = vadd.f32 %v537_v62, %v461_v20  ;;  %v1267_v20 = vld [vmem:[#allocation2 + $0x269] ss:$0 sm:$0xff] }
 0x574   :  { %v546_v0 = vsel %vm43_vm0, %v1484_v63, 0.0  ;;  %v552_v1 = vmul.f32 %v1484_v63, %v1484_v63 }
 0x575   :  { %547 = vadd.xlane.f32.xlu2 %v546_v0  ;;  %v1271_v0 = vld [vmem:[#allocation2 + $0x26d] ss:$0 sm:$0xff] }
 0x576   :  { %v556_v2 = vsel %vm43_vm0, %v552_v1, 0.0 }
 0x577   :  { %557 = vadd.xlane.f32.xlu0 %v556_v2 }
 0x5e0   :  { %v545_v15 = vpop.xlane.xlu0 %544 }
 0x5e1   :  { %v549_v16 = vmul.f32 %v545_v15, %v1461_v54 }
 0x5e2   :  { %v555_v17 = vpop.xlane.xlu1 %554 }
 0x5e3   :  { %v561_v18 = vmul.f32 %v549_v16, %v549_v16  ;;  %v559_v19 = vmul.f32 %v555_v17, %v1461_v54  ;;  %v565_v44 = vsub.f32 %v1477_v57, %v549_v16 }
 0x5e5   :  { %v563_v21 = vsub.f32 %v559_v19, %v561_v18 }
 0x5e7   :  { %v567_v27 = vadd.f32 1e-05, %v563_v21 }
 0x5e8   :  { %v548_v28 = vpop.xlane.xlu2 %547 }
 0x5e9   :  { %1295 = vrsqrt.f32 %v567_v27  ;;  %v550_v30 = vmul.f32 %v548_v28, %v1461_v54  ;;  %vm575_vm10 = vweird.f32 %v567_v27 }
 0x5ea   :  { %v558_v32 = vpop.xlane.xlu0 %557 }
 0x5eb   :  { %v562_v34 = vmul.f32 %v550_v30, %v550_v30  ;;  %v560_v36 = vmul.f32 %v558_v32, %v1461_v54  ;;  %v566_v52 = vsub.f32 %v1484_v63, %v550_v30 }
 0x5ed   :  { %v564_v23 = vsub.f32 %v560_v36, %v562_v34 }
 0x5ef   :  { %v1296_v38 = vpop.eup %1295  ;;  %v568_v39 = vadd.f32 1e-05, %v564_v23 }
 0x5f0   :  { %v570_v40 = vmul.f32 %v1296_v38, %v567_v27  ;;  %vm576_vm9 = vweird.f32 %v1296_v38 }
 0x5f1   :  { %1297 = vrsqrt.f32 %v568_v39  ;;  %vm577_vm11 = vmor %vm575_vm10, %vm576_vm9  ;;  %vm585_vm13 = vweird.f32 %v568_v39 }
 0x5f2   :  { %v571_v24 = vmul.f32 %v1296_v38, %v570_v40 }
 0x5f4   :  { %v572_v41 = vmul.f32 0.5, %v571_v24 }
 0x5f6   :  { %v573_v43 = vsub.f32 1.5, %v572_v41 }
 0x5f7   :  { %v1298_v25 = vpop.eup %1297 }
 0x5f8   :  { %v574_v37 = vmul.f32 %v1296_v38, %v573_v43  ;;  %v580_v26 = vmul.f32 %v1298_v25, %v568_v39  ;;  %vm586_vm12 = vweird.f32 %v1298_v25 }
 0x5f9   :  { %vm587_vm14 = vmor %vm585_vm13, %vm586_vm12 }
 0x5fa   :  { %v578_v45 = vsel %vm577_vm11, %v1296_v38, %v574_v37  ;;  %v581_v46 = vmul.f32 %v1298_v25, %v580_v26  ;;  %v889_v37 = vld [vmem:[#allocation2 + $0x1b8] sm:$0xff]  ;;  %v888_v26 = vld [vmem:[#allocation2 + $0x1b0] sm:$0xff] }
 0x5fb   :  { %v589_v47 = vmul.f32 %v578_v45, %v565_v44 }
 0x5fc   :  { %v582_v48 = vmul.f32 0.5, %v581_v46 }
 0x5fd   :  { %v592_v49 = vmul.f32 %v1267_v20, %v589_v47 }
 0x5fe   :  { %v583_v22 = vsub.f32 1.5, %v582_v48 }
 0x5ff   :  { %v1500_v50 = vadd.f32 %v1268_v42, %v592_v49  ;;  %v886_v49 = vld [vmem:[#allocation2 + $0x1a0] sm:$0xff] }
 0x600   :  { %v584_v51 = vmul.f32 %v1298_v25, %v583_v22 }
 0x601   :  { %1220 = vmatmul.msk.f32.vlgmr.msrb.gmra.mxu1 %vm43_vm0, %v1500_v50  ;;  %1222 = vmatmul.msk.f32.vlgmr.msra.gmra.mxu2 %vm43_vm0, %v1500_v50 }
 0x602   :  { %v588_v53 = vsel %vm587_vm14, %v1298_v25, %v584_v51  ;;  %1224 = vmatmul.msk.f32.vlgmr.msrb.gmra.mxu3 %vm43_vm0, %v1500_v50 }
 0x603   :  { %v590_v55 = vmul.f32 %v588_v53, %v566_v52  ;;  %v1272_v52 = vld [vmem:[#allocation2 + $0x26e] ss:$0 sm:$0xff] }
 0x605   :  { %v593_v56 = vmul.f32 %v1267_v20, %v590_v55  ;;  %v887_v20 = vld [vmem:[#allocation2 + $0x1a8] sm:$0xff] }
 0x607   :  { %v1509_v57 = vadd.f32 %v1268_v42, %v593_v56 }
 0x609   :  { %1221 = vmatmul.msk.f32.gmra.mxu1 %vm43_vm0, %v1509_v57  ;;  %1223 = vmatmul.msk.f32.gmra.mxu2 %vm43_vm0, %v1509_v57 }
 0x60a   :  { %1225 = vmatmul.msk.f32.gmra.mxu3 %vm43_vm0, %v1509_v57 }
 0x67e   :  { %v626_v9 = vpop.f32.mrf.mxu1 }
 0x67f   :  { %v627_v16 = vadd.f32 %v1269_v10, %v626_v9 }
 0x684   :  { %v655_v59 = vpop.f32.mrf.mxu2 }
 0x685   :  { %v656_v60 = vadd.f32 %v1270_v58, %v655_v59  ;;  %v684_v61 = vpop.f32.mrf.mxu3 }
 0x686   :  { %v685_v7 = vadd.f32 %v1271_v0, %v684_v61  ;;  %v629_v21 = vpop.f32.mrf.mxu1 }
 0x687   :  { %v693_v62 = vmul.f32 %v656_v60, %v1399_v29  ;;  %v692_v63 = vmul.f32 %v656_v60, %v1401_v31  ;;  %v691_v6 = vmul.f32 %v656_v60, %v1404_v33  ;;  %v690_v12 = vmul.f32 %v656_v60, %v1407_v35 }
 0x688   :  { %v697_v15 = vmul.f32 %v685_v7, %v1399_v29  ;;  %v696_v18 = vmul.f32 %v685_v7, %v1401_v31  ;;  %v694_v27 = vmul.f32 %v685_v7, %v1407_v35 }
 0x689   :  { %1226 = vmatpush.xpose.msk.msra.mxu1 %vm43_vm0, %v693_v62 }
 0x68c   :  { %v658_v1 = vpop.f32.mrf.mxu2 }
 0x68d   :  { %v659_v2 = vadd.f32 %v1270_v58, %v658_v1  ;;  %v687_v3 = vpop.f32.mrf.mxu3  ;;  %1227 = vmatpush.xpose.msk.msra.mxu1 %vm43_vm0, %v692_v63 }
 0x68e   :  { %v688_v4 = vadd.f32 %v1271_v0, %v687_v3  ;;  %v981_v3 = vld [vmem:[#allocation2 + $0x1d0] sm:$0xff] }
 0x68f   :  { %v791_v5 = vmul.f32 %v659_v2, %v1399_v29  ;;  %v790_v13 = vmul.f32 %v659_v2, %v1401_v31  ;;  %v789_v19 = vmul.f32 %v659_v2, %v1404_v33  ;;  %v788_v28 = vmul.f32 %v659_v2, %v1407_v35  ;;  %v982_v2 = vld [vmem:[#allocation2 + $0x1d8] sm:$0xff] }
 0x690   :  { %v795_v8 = vmul.f32 %v688_v4, %v1399_v29  ;;  %v794_v11 = vmul.f32 %v688_v4, %v1401_v31  ;;  %v793_v14 = vmul.f32 %v688_v4, %v1404_v33  ;;  %v792_v17 = vmul.f32 %v688_v4, %v1407_v35  ;;  %v980_v4 = vld [vmem:[#allocation2 + $0x1c8] sm:$0xff] }
 0x691   :  { %1228 = vmatpush.xpose.msk.msra.mxu1 %vm43_vm0, %v691_v6  ;;  %1233 = vmatpush.xpose.msk.msrb.mxu2 %vm43_vm0, %v791_v5  ;;  %v695_v29 = vmul.f32 %v685_v7, %v1404_v33  ;;  %v630_v31 = vadd.f32 %v1269_v10, %v629_v21  ;;  %v979_v6 = vld [vmem:[#allocation2 + $0x1c0] sm:$0xff] }
 0x692   :  { %878 = vmatpush.msrb.mxu0 %v795_v8 }
 0x694   :  { %879 = vmatpush.msrb.mxu0 %v794_v11 }
 0x695   :  { %1229 = vmatpush.xpose.msk.msra.mxu1 %vm43_vm0, %v690_v12  ;;  %1234 = vmatpush.xpose.msk.msrb.mxu2 %vm43_vm0, %v790_v13 }
 0x696   :  { %880 = vmatpush.msrb.mxu0 %v793_v14 }
 0x698   :  { %881 = vmatpush.msrb.mxu0 %v792_v17  ;;  %1230 = vmatmul.msk.f32.vlgmr.msra.gmra.mxu1 %vm43_vm0, %v627_v16 }
 0x699   :  { %780 = vmatpush.msrb.mxu1 %v697_v15  ;;  %1235 = vmatpush.xpose.msk.msrb.mxu2 %vm43_vm0, %v789_v19  ;;  %v1022_v19 = vld [vmem:[#allocation2 + $0x210] sm:$0xff] }
 0x69b   :  { %781 = vmatpush.msrb.mxu1 %v696_v18  ;;  %v1023_v18 = vld [vmem:[#allocation2 + $0x218] sm:$0xff] }
 0x69c   :  { %1040 = vmatpush.msrb.mxu3 %v1023_v18 }
 0x69d   :  { %782 = vmatpush.msrb.mxu1 %v695_v29  ;;  %1236 = vmatpush.xpose.msk.msrb.mxu2 %vm43_vm0, %v788_v28 }
 0x69e   :  { %1041 = vmatpush.msrb.mxu3 %v1022_v19 }
 0x69f   :  { %783 = vmatpush.msrb.mxu1 %v694_v27 }
 0x6a0   :  { %1237 = vmatmul.msk.f32.vlgmr.msrb.gmra.mxu2 %vm43_vm0, %v630_v31  ;;  %v1021_v31 = vld [vmem:[#allocation2 + $0x208] sm:$0xff] }
 0x6a1   :  { %910 = vmatpush.msra.mxu1 %v889_v37  ;;  %1003 = vmatpush.msra.mxu2 %v982_v2 }
 0x6a2   :  { %1042 = vmatpush.msrb.mxu3 %v1021_v31 }
 0x6a3   :  { %911 = vmatpush.msra.mxu1 %v888_v26  ;;  %1004 = vmatpush.msra.mxu2 %v981_v3 }
 0x6a5   :  { %912 = vmatpush.msra.mxu1 %v887_v20  ;;  %1005 = vmatpush.msra.mxu2 %v980_v4 }
 0x6a7   :  { %913 = vmatpush.msra.mxu1 %v886_v49  ;;  %1006 = vmatpush.msra.mxu2 %v979_v6  ;;  %v1018_v49 = vld [vmem:[#allocation2 + $0x1f0] sm:$0xff] }
 0x715   :  { %v730_v30 = vpop.f32.mrf.mxu1 }
 0x716   :  { %v733_v32 = vmul.f32 0.35355338, %v730_v30 }
 0x718   :  { %v734_v34 = vsel %vm43_vm0, %v733_v32, -inf }
 0x719   :  { %735 = vmax.xlane.f32.xlu1 %v734_v34  ;;  %v1273_v34 = vld [vmem:[#allocation2 + $0x26f] ss:$0 sm:$0xff] }
 0x723   :  { %v828_v36 = vpop.f32.mrf.mxu2 }
 0x724   :  { %v831_v23 = vmul.f32 0.35355338, %v828_v36 }
 0x726   :  { %v832_v33 = vsel %vm43_vm0, %v831_v23, -inf }
 0x727   :  { %833 = vmax.xlane.f32.xlu2 %v832_v33 }
 0x78c   :  { %v736_v38 = vpop.xlane.xlu1 %735 }
 0x78d   :  { %v737_v39 = vsub.f32 %v733_v32, %v736_v38 }
 0x78f   :  { %v738_v40 = vmul.f32 1.442695, %v737_v39 }
 0x791   :  { %1299 = vpow2.f32 %v738_v40  ;;  %v1274_v40 = vld [vmem:[#allocation2 + $0x270] ss:$0 sm:$0xff] }
 0x797   :  { %v1300_v35 = vpop.eup %1299 }
 0x798   :  { %1231 = vmatmul.msk.f32.vlgmr.msra.gmra.mxu0 %vm43_vm0, %v1300_v35 }
 0x79a   :  { %v834_v24 = vpop.xlane.xlu2 %833 }
 0x79b   :  { %v835_v41 = vsub.f32 %v831_v23, %v834_v24  ;;  %v1020_v23 = vld [vmem:[#allocation2 + $0x200] sm:$0xff] }
 0x79c   :  { %1043 = vmatpush.msrb.mxu3 %v1020_v23 }
 0x79d   :  { %v836_v43 = vmul.f32 1.442695, %v835_v41 }
 0x79f   :  { %1301 = vpow2.f32 %v836_v43 }
 0x7a5   :  { %v1302_v25 = vpop.eup %1301 }
 0x7a6   :  { %1238 = vmatmul.msk.f32.vlgmr.msra.gmra.mxu3 %vm43_vm0, %v1302_v25 }
 0x815   :  { %v760_v44 = vpop.f32.mrf.mxu0 }
 0x816   :  { %1303 = vrcp.f32 %v760_v44 }
 0x81c   :  { %v1304_v45 = vpop.eup %1303 }
 0x81d   :  { %v764_v46 = vmul.f32 %v1304_v45, %v1300_v35  ;;  %v1019_v35 = vld [vmem:[#allocation2 + $0x1f8] sm:$0xff] }
 0x81e   :  { %1044 = vmatpush.msrb.mxu3 %v1019_v35 }
 0x81f   :  { %1232 = vmatmul.msk.f32.vlgmr.msrb.gmra.mxu1 %vm43_vm0, %v764_v46 }
 0x820   :  { %1045 = vmatpush.msrb.mxu3 %v1018_v49 }
 0x829   :  { %v858_v47 = vpop.f32.mrf.mxu3 }
 0x82a   :  { %1305 = vrcp.f32 %v858_v47 }
 0x830   :  { %v1306_v42 = vpop.eup %1305 }
 0x831   :  { %v862_v48 = vmul.f32 %v1306_v42, %v1302_v25 }
 0x833   :  { %1239 = vmatmul.msk.f32.vlgmr.msrb.gmra.mxu0 %vm43_vm0, %v862_v48 }
 0x89c   :  { %v785_v22 = vpop.f32.mrf.mxu1 }
 0x89d   :  { %1240 = vmatmul.msk.f32.vlgmr.msra.gmra.mxu1 %vm43_vm0, %v785_v22  ;;  %v1017_v22 = vld [vmem:[#allocation2 + $0x1e8] sm:$0xff] }
 0x89e   :  { %1046 = vmatpush.msrb.mxu3 %v1017_v22 }
 0x8b0   :  { %v883_v51 = vpop.f32.mrf.mxu0 }
 0x8b1   :  { %1241 = vmatmul.msk.f32.gmra.mxu1 %vm43_vm0, %v883_v51  ;;  %v1016_v51 = vld [vmem:[#allocation2 + $0x1e0] sm:$0xff] }
 0x8b2   :  { %1047 = vmatpush.msrb.mxu3 %v1016_v51  ;;  %v1152_v51 = vld [vmem:[#allocation2 + $0x250] sm:$0xff] }
 0x91a   :  { %v915_v53 = vpop.f32.mrf.mxu1 }
 0x91b   :  { %v916_v55 = vadd.f32 %v1272_v52, %v915_v53 }
 0x91d   :  { %v921_v56 = vadd.f32 %v916_v55, %v1500_v50 }
 0x91f   :  { %v925_v58 = vsel %vm43_vm0, %v921_v56, 0.0  ;;  %v933_v59 = vmul.f32 %v921_v56, %v921_v56 }
 0x920   :  { %926 = vadd.xlane.f32.xlu0 %v925_v58 }
 0x921   :  { %v935_v60 = vsel %vm43_vm0, %v933_v59, 0.0 }
 0x922   :  { %936 = vadd.xlane.f32.xlu1 %v935_v60 }
 0x92e   :  { %v918_v61 = vpop.f32.mrf.mxu1 }
 0x92f   :  { %v919_v62 = vadd.f32 %v1272_v52, %v918_v61  ;;  %v1275_v52 = vld [vmem:[#allocation2 + $0x271] ss:$0 sm:$0xff]  ;;  %v1276_v61 = vld [vmem:[#allocation2 + $0x272] ss:$0 sm:$0xff] }
 0x931   :  { %v1555_v63 = vadd.f32 %v919_v62, %v1509_v57 }
 0x933   :  { %v928_v0 = vsel %vm43_vm0, %v1555_v63, 0.0  ;;  %v934_v1 = vmul.f32 %v1555_v63, %v1555_v63 }
 0x934   :  { %929 = vadd.xlane.f32.xlu2 %v928_v0 }
 0x935   :  { %v938_v50 = vsel %vm43_vm0, %v934_v1, 0.0 }
 0x936   :  { %939 = vadd.xlane.f32.xlu0 %v938_v50 }
 0x993   :  { %v927_v5 = vpop.xlane.xlu0 %926 }
 0x994   :  { %v931_v57 = vmul.f32 %v927_v5, %v1461_v54 }
 0x995   :  { %v937_v7 = vpop.xlane.xlu1 %936 }
 0x996   :  { %v943_v8 = vmul.f32 %v931_v57, %v931_v57  ;;  %v941_v9 = vmul.f32 %v937_v7, %v1461_v54  ;;  %v947_v32 = vsub.f32 %v921_v56, %v931_v57 }
 0x998   :  { %v945_v10 = vsub.f32 %v941_v9, %v943_v8  ;;  %v1116_v8 = vld [vmem:[#allocation2 + $0x238] sm:$0xff]  ;;  %v1115_v9 = vld [vmem:[#allocation2 + $0x230] sm:$0xff] }
 0x999   :  { %1137 = vmatpush.msra.mxu0 %v1116_v8 }
 0x99a   :  { %v949_v11 = vadd.f32 1e-05, %v945_v10  ;;  %v1114_v10 = vld [vmem:[#allocation2 + $0x228] sm:$0xff] }
 0x99b   :  { %1138 = vmatpush.msra.mxu0 %v1115_v9 }
 0x99c   :  { %1307 = vrsqrt.f32 %v949_v11  ;;  %vm957_vm1 = vweird.f32 %v949_v11 }
 0x99d   :  { %1139 = vmatpush.msra.mxu0 %v1114_v10 }
 0x9a2   :  { %v1308_v12 = vpop.eup %1307 }
 0x9a3   :  { %v952_v13 = vmul.f32 %v1308_v12, %v949_v11  ;;  %vm958_vm15 = vweird.f32 %v1308_v12 }
 0x9a4   :  { %vm959_vm2 = vmor %vm957_vm1, %vm958_vm15 }
 0x9a5   :  { %v953_v14 = vmul.f32 %v1308_v12, %v952_v13  ;;  %v1113_v13 = vld [vmem:[#allocation2 + $0x220] sm:$0xff] }
 0x9a6   :  { %1140 = vmatpush.msra.mxu0 %v1113_v13 }
 0x9a7   :  { %v954_v15 = vmul.f32 0.5, %v953_v14  ;;  %v930_v16 = vpop.xlane.xlu2 %929 }
 0x9a8   :  { %v932_v17 = vmul.f32 %v930_v16, %v1461_v54 }
 0x9a9   :  { %v955_v29 = vsub.f32 1.5, %v954_v15  ;;  %v940_v21 = vpop.xlane.xlu0 %939 }
 0x9aa   :  { %v944_v27 = vmul.f32 %v932_v17, %v932_v17  ;;  %v942_v28 = vmul.f32 %v940_v21, %v1461_v54  ;;  %v948_v45 = vsub.f32 %v1555_v63, %v932_v17 }
 0x9ab   :  { %v956_v30 = vmul.f32 %v1308_v12, %v955_v29 }
 0x9ac   :  { %v946_v36 = vsub.f32 %v942_v28, %v944_v27 }
 0x9ad   :  { %v960_v33 = vsel %vm959_vm2, %v1308_v12, %v956_v30  ;;  %v1153_v30 = vld [vmem:[#allocation2 + $0x258] sm:$0xff] }
 0x9ae   :  { %v971_v38 = vmul.f32 %v960_v33, %v947_v32  ;;  %v950_v39 = vadd.f32 1e-05, %v946_v36  ;;  %1174 = vmatpush.msrb.mxu1 %v1153_v30 }
 0x9b0   :  { %v974_v24 = vmul.f32 %v1273_v34, %v971_v38  ;;  %1309 = vrsqrt.f32 %v950_v39  ;;  %vm967_vm4 = vweird.f32 %v950_v39  ;;  %1175 = vmatpush.msrb.mxu1 %v1152_v51 }
 0x9b2   :  { %v977_v41 = vadd.f32 %v1274_v40, %v974_v24 }
 0x9b4   :  { %1242 = vmatmul.msk.f32.vlgmr.msra.gmra.mxu2 %vm43_vm0, %v977_v41 }
 0x9b6   :  { %v1310_v43 = vpop.eup %1309 }
 0x9b7   :  { %v962_v25 = vmul.f32 %v1310_v43, %v950_v39  ;;  %vm968_vm3 = vweird.f32 %v1310_v43  ;;  %v1277_v39 = vld [vmem:[#allocation2 + $0x273] ss:$0 sm:$0xff] }
 0x9b8   :  { %vm969_vm5 = vmor %vm967_vm4, %vm968_vm3 }
 0x9b9   :  { %v963_v37 = vmul.f32 %v1310_v43, %v962_v25 }
 0x9bb   :  { %v964_v26 = vmul.f32 0.5, %v963_v37 }
 0x9bd   :  { %v965_v44 = vsub.f32 1.5, %v964_v26 }
 0x9bf   :  { %v966_v20 = vmul.f32 %v1310_v43, %v965_v44 }
 0x9c1   :  { %v970_v46 = vsel %vm969_vm5, %v1310_v43, %v966_v20  ;;  %v1278_v43 = vld [vmem:[#allocation2 + $0x274] ss:$0 sm:$0xff] }
 0x9c2   :  { %v972_v47 = vmul.f32 %v970_v46, %v948_v45 }
 0x9c4   :  { %v975_v42 = vmul.f32 %v1273_v34, %v972_v47 }
 0x9c6   :  { %v978_v48 = vadd.f32 %v1274_v40, %v975_v42 }
 0x9c8   :  { %1243 = vmatmul.msk.f32.gmra.mxu2 %vm43_vm0, %v978_v48 }
 0xa37   :  { %v1008_v53 = vpop.f32.mrf.mxu2 }
 0xa38   :  { %v1009_v55 = vadd.f32 %v1275_v52, %v1008_v53  ;;  %v1150_v53 = vld [vmem:[#allocation2 + $0x240] sm:$0xff] }
 0xa3a   :  { %v1014_v56 = vmax.f32 %v1009_v55, 0.0  ;;  %v1279_v55 = vld [vmem:[#allocation2 + $0x275] ss:$0 sm:$0xff] }
 0xa3c   :  { %1244 = vmatmul.msk.f32.vlgmr.msrb.gmra.mxu3 %vm509_vm8, %v1014_v56 }
 0xa4b   :  { %v1011_v58 = vpop.f32.mrf.mxu2 }
 0xa4c   :  { %v1012_v59 = vadd.f32 %v1275_v52, %v1011_v58  ;;  %v1151_v52 = vld [vmem:[#allocation2 + $0x248] sm:$0xff] }
 0xa4d   :  { %1176 = vmatpush.msrb.mxu1 %v1151_v52 }
 0xa4e   :  { %v1015_v60 = vmax.f32 %v1012_v59, 0.0 }
 0xa4f   :  { %1177 = vmatpush.msrb.mxu1 %v1150_v53 }
 0xa50   :  { %1245 = vmatmul.msk.f32.gmra.mxu3 %vm509_vm8, %v1015_v60 }
 0xabf   :  { %v1049_v62 = vpop.f32.mrf.mxu3 }
 0xac0   :  { %v1050_v63 = vadd.f32 %v1276_v61, %v1049_v62 }
 0xac2   :  { %v1055_v0 = vadd.f32 %v1050_v63, %v977_v41  ;;  %v1280_v63 = vld [vmem:[#allocation2 + $0x276] ss:$0 sm:$0xff] }
 0xac4   :  { %v1059_v1 = vsel %vm43_vm0, %v1055_v0, 0.0  ;;  %v1067_v50 = vmul.f32 %v1055_v0, %v1055_v0 }
 0xac5   :  { %1060 = vadd.xlane.f32.xlu1 %v1059_v1 }
 0xac6   :  { %v1069_v2 = vsel %vm43_vm0, %v1067_v50, 0.0 }
 0xac7   :  { %1070 = vadd.xlane.f32.xlu2 %v1069_v2 }
 0xad3   :  { %v1052_v3 = vpop.f32.mrf.mxu3 }
 0xad4   :  { %v1053_v4 = vadd.f32 %v1276_v61, %v1052_v3 }
 0xad6   :  { %v1056_v5 = vadd.f32 %v1053_v4, %v978_v48 }
 0xad8   :  { %v1062_v57 = vsel %vm43_vm0, %v1056_v5, 0.0  ;;  %v1068_v6 = vmul.f32 %v1056_v5, %v1056_v5 }
 0xad9   :  { %1063 = vadd.xlane.f32.xlu0 %v1062_v57 }
 0xada   :  { %v1072_v7 = vsel %vm43_vm0, %v1068_v6, 0.0 }
 0xadb   :  { %1073 = vadd.xlane.f32.xlu1 %v1072_v7 }
 0xb38   :  { %v1061_v11 = vpop.xlane.xlu1 %1060 }
 0xb39   :  { %v1065_v12 = vmul.f32 %v1061_v11, %v1461_v54 }
 0xb3a   :  { %v1071_v14 = vpop.xlane.xlu2 %1070 }
 0xb3b   :  { %v1077_v15 = vmul.f32 %v1065_v12, %v1065_v12  ;;  %v1075_v16 = vmul.f32 %v1071_v14, %v1461_v54  ;;  %v1081_v38 = vsub.f32 %v1055_v0, %v1065_v12 }
 0xb3d   :  { %v1079_v17 = vsub.f32 %v1075_v16, %v1077_v15 }
 0xb3f   :  { %v1083_v18 = vadd.f32 1e-05, %v1079_v17 }
 0xb41   :  { %1311 = vrsqrt.f32 %v1083_v18  ;;  %vm1091_vm7 = vweird.f32 %v1083_v18 }
 0xb47   :  { %v1312_v19 = vpop.eup %1311 }
 0xb48   :  { %v1086_v29 = vmul.f32 %v1312_v19, %v1083_v18  ;;  %vm1092_vm6 = vweird.f32 %v1312_v19 }
 0xb49   :  { %vm1093_vm8 = vmor %vm1091_vm7, %vm1092_vm6 }
 0xb4a   :  { %v1087_v21 = vmul.f32 %v1312_v19, %v1086_v29 }
 0xb4c   :  { %v1088_v27 = vmul.f32 0.5, %v1087_v21  ;;  %v1064_v28 = vpop.xlane.xlu0 %1063 }
 0xb4d   :  { %v1066_v31 = vmul.f32 %v1064_v28, %v1461_v54 }
 0xb4e   :  { %v1089_v32 = vsub.f32 1.5, %v1088_v27  ;;  %v1074_v34 = vpop.xlane.xlu1 %1073 }
 0xb4f   :  { %v1078_v36 = vmul.f32 %v1066_v31, %v1066_v31  ;;  %v1076_v23 = vmul.f32 %v1074_v34, %v1461_v54  ;;  %v1082_v47 = vsub.f32 %v1056_v5, %v1066_v31 }
 0xb50   :  { %v1090_v33 = vmul.f32 %v1312_v19, %v1089_v32 }
 0xb51   :  { %v1080_v40 = vsub.f32 %v1076_v23, %v1078_v36 }
 0xb52   :  { %v1094_v35 = vsel %vm1093_vm8, %v1312_v19, %v1090_v33 }
 0xb53   :  { %v1105_v24 = vmul.f32 %v1094_v35, %v1081_v38  ;;  %v1084_v41 = vadd.f32 1e-05, %v1080_v40 }
 0xb55   :  { %v1108_v25 = vmul.f32 %v1277_v39, %v1105_v24  ;;  %1313 = vrsqrt.f32 %v1084_v41  ;;  %vm1101_vm10 = vweird.f32 %v1084_v41 }
 0xb57   :  { %v1111_v37 = vadd.f32 %v1278_v43, %v1108_v25 }
 0xb59   :  { %1246 = vmatmul.msk.f32.vlgmr.msra.gmra.mxu0 %vm43_vm0, %v1111_v37 }
 0xb5b   :  { %v1314_v26 = vpop.eup %1313 }
 0xb5c   :  { %v1096_v44 = vmul.f32 %v1314_v26, %v1084_v41  ;;  %vm1102_vm9 = vweird.f32 %v1314_v26 }
 0xb5d   :  { %vm1103_vm11 = vmor %vm1101_vm10, %vm1102_vm9 }
 0xb5e   :  { %v1097_v20 = vmul.f32 %v1314_v26, %v1096_v44 }
 0xb60   :  { %v1098_v45 = vmul.f32 0.5, %v1097_v20 }
 0xb62   :  { %v1099_v54 = vsub.f32 1.5, %v1098_v45 }
 0xb64   :  { %v1100_v46 = vmul.f32 %v1314_v26, %v1099_v54 }
 0xb66   :  { %v1104_v42 = vsel %vm1103_vm11, %v1314_v26, %v1100_v46 }
 0xb67   :  { %v1106_v48 = vmul.f32 %v1104_v42, %v1082_v47 }
 0xb69   :  { %v1109_v49 = vmul.f32 %v1277_v39, %v1106_v48 }
 0xb6b   :  { %v1112_v22 = vadd.f32 %v1278_v43, %v1109_v49 }
 0xb6d   :  { %1247 = vmatmul.msk.f32.gmra.mxu0 %vm43_vm0, %v1112_v22 }
 0xbd6   :  { %v1142_v56 = vpop.f32.mrf.mxu0 }
 0xbd7   :  { %v1143_v58 = vadd.f32 %v1279_v55, %v1142_v56 }
 0xbd9   :  { %v1148_v59 = vmax.f32 %v1143_v58, 0.0 }
 0xbdb   :  { %1248 = vmatmul.msk.f32.vlgmr.msrb.gmra.mxu1 %vm43_vm0, %v1148_v59 }
 0xbea   :  { %v1145_v60 = vpop.f32.mrf.mxu0 }
 0xbeb   :  { %v1146_v61 = vadd.f32 %v1279_v55, %v1145_v60 }
 0xbed   :  { %v1149_v62 = vmax.f32 %v1146_v61, 0.0 }
 0xbef   :  { %1249 = vmatmul.msk.f32.gmra.mxu1 %vm43_vm0, %v1149_v62 }
 0xc58   :  { %v1179_v0 = vpop.f32.mrf.mxu1 }
 0xc59   :  { %v1180_v1 = vadd.f32 %v1280_v63, %v1179_v0 }
 0xc5b   :  { %1185 = vst [vmem:[%s1591_s2] sm:$0xff] %v1180_v1 }
 0xc6c   :  { %v1182_v50 = vpop.f32.mrf.mxu1 }
 0xc6d   :  { %v1183_v2 = vadd.f32 %v1280_v63, %v1182_v50 }
 0xc6f   :  { %1186 = vst [vmem:[%s1591_s2 + $0x8] sm:$0xff] %v1183_v2 }
 0xc70   :  { %1191 = vsyncpa [#allocation3], 1 }

</bundles_post_ra>
